<compile_context>
chip_gen: v6e
topology: v6e:2x2x1
jax: 0.10.0
libtpu: 0.0.40
codegen_flags: <defaults>
</compile_context>

<pallas_src>
import functools

import jax
import jax.numpy as jnp
from jax import lax
from jax.experimental import pallas as pl
from jax.experimental.pallas import tpu as pltpu


# ----------------------------- kernel helpers --------------------------------

def _masked_layer_norm(y, gamma, beta, n_valid, eps=1e-5):
    """LayerNorm over the first `n_valid` lanes of a 128-padded feature axis."""
    fp = y.shape[-1]
    mask = (lax.broadcasted_iota(jnp.int32, (1, fp), 1) < n_valid).astype(y.dtype)
    inv_n = 1.0 / float(n_valid)
    mean = jnp.sum(y * mask, axis=-1, keepdims=True) * inv_n
    d = (y - mean) * mask
    var = jnp.sum(d * d, axis=-1, keepdims=True) * inv_n
    return d * lax.rsqrt(var + eps) * gamma + beta


# ----------------------------- edge-phase kernel -----------------------------

def _edge_kernel(n_edge_out,
                 h_ref, x_ref, hf_ref,
                 ew1, eb1, ew2, eb2, ew3, eb3, eg, ebt,
                 out_e_ref, upd_e_ref,
                 xe_acc):
    t = pl.program_id(0)

    @pl.when(t == 0)
    def _():
        xe_acc[...] = jnp.zeros_like(xe_acc)

    # Xe += H_tile^T @ X_tile.  H stays in its storage dtype (bf16 default);
    # X is cast to the same dtype so the MXU does a single-pass matmul that
    # accumulates into the f32 scratch.  (h_dtype=f32 reproduces the reference
    # exactly.)  NOTE: a pre-transposed H^T input would avoid any lhs
    # transpose Mosaic may insert here, at the cost of a 2nd incidence array.
    xe_acc[...] += lax.dot_general(
        h_ref[...], x_ref[...].astype(h_ref.dtype),
        dimension_numbers=(((0,), (0,)), ((), ())),
        preferred_element_type=jnp.float32)

    @pl.when(t == pl.num_programs(0) - 1)
    def _():
        hf = hf_ref[...]
        # edge_fn MLP on cat([Xe, hf]); first layer fused into one K=256 matmul.
        cat = jnp.concatenate([xe_acc[...], hf], axis=-1)
        h1 = jnp.maximum(
            jnp.dot(cat, ew1[...], preferred_element_type=jnp.float32) + eb1[...],
            0.0)
        h2 = jnp.maximum(
            jnp.dot(h1, ew2[...], preferred_element_type=jnp.float32) + eb2[...],
            0.0)
        y = jnp.dot(h2, ew3[...], preferred_element_type=jnp.float32) + eb3[...]
        y = _masked_layer_norm(y, eg[...], ebt[...], n_edge_out)
        upd_e_ref[...] = y.astype(upd_e_ref.dtype)   # pre-residual -> node phase
        out_e_ref[...] = y + hf                      # module output (residual)


# ----------------------------- node-phase kernel ------------------------------

def _node_kernel(n_node_out,
                 h_ref, upd_e_ref, x_ref,
                 nw1, nb1, nw2, nb2, nw3, nb3, ng, nbt,
                 out_n_ref):
    # Xv = H_tile @ upd_e  (both operands already in h_dtype -> bf16 MXU path).
    xv = jnp.dot(h_ref[...], upd_e_ref[...], preferred_element_type=jnp.float32)
    x = x_ref[...]
    # node_fn MLP on cat([Xv, X]); first layer fused into one K=256 matmul.
    cat = jnp.concatenate([xv, x], axis=-1)
    h1 = jnp.maximum(
        jnp.dot(cat, nw1[...], preferred_element_type=jnp.float32) + nb1[...],
        0.0)
    h2 = jnp.maximum(
        jnp.dot(h1, nw2[...], preferred_element_type=jnp.float32) + nb2[...],
        0.0)
    y = jnp.dot(h2, nw3[...], preferred_element_type=jnp.float32) + nb3[...]
    y = _masked_layer_norm(y, ng[...], nbt[...], n_node_out)
    out_n_ref[...] = y + x                           # module output (residual)


# ----------------------------- wrapper ----------------------------------------

def _round_up(x, m):
    return ((x + m - 1) // m) * m


def _pick_row_tile(n, target):
    """Largest row tile <= target that divides n and is a multiple of 8 (else n)."""
    if n <= target:
        return n
    t = (min(target, n) // 8) * 8
    while t >= 8:
        if n % t == 0:
            return t
        t -= 8
    return n


def unignn_interaction_network(X, vertices, hyperedges, hyperedge_features, params,
                               *, row_tile=256, feature_pad=128,
                               h_dtype=jnp.bfloat16, H=None,
                               vmem_limit_bytes=None):
    """Pallas implementation of UniGNNInteractionNetwork.forward (concatenate=False).

    h_dtype=bf16 (default): incidence matmuls run on the bf16 MXU path
    (accumulated in f32); h_dtype=f32 matches the f32 reference to ~1e-6.
    """
    N, nnode_in = X.shape
    E, nedge_in = hyperedge_features.shape
    f32 = jnp.float32
    p = params
    hidden = p["e_w2"].shape[0]
    nedge_out = p["e_w3"].shape[1]
    nnode_out = p["n_w3"].shape[1]
    FP = feature_pad
    assert max(nnode_in, nedge_in, nedge_out, nnode_out, hidden) <= FP

    E_pad = max(FP, _round_up(E, 128))      # lane-dense hyperedge axis

    if H is None:
        # Incidence matrix with multiplicities, built by O(M) scatter-add (no
        # dense one-hot intermediates).  For static topology, build once
        # outside the step function and pass it in via `H=`.
        # NOTE: bf16 holds integer counts exactly only up to 256; keep
        # h_dtype=float32 if a (vertex, hyperedge) pair can repeat more often.
        H = (jnp.zeros((N, E_pad), f32)
             .at[vertices, hyperedges].add(1.0)).astype(h_dtype)
    else:
        H = H.astype(h_dtype)
        if H.shape[1] != E_pad:
            H = jnp.pad(H, ((0, 0), (0, E_pad - H.shape[1])))

    def pad2(a, rows, cols):
        a = jnp.asarray(a, f32)
        return jnp.pad(a, ((0, rows - a.shape[0]), (0, cols - a.shape[1])))

    Xp = pad2(X, N, FP)
    hfp = pad2(hyperedge_features, E_pad, FP)

    # Fused first-layer weights (K = 2*FP = 256); cat order matches the kernels
    # and the torch reference: edge cat([Xe, hf]), node cat([Xv, X]).
    e_w1 = jnp.concatenate([pad2(p["e_w1x"], FP, FP), pad2(p["e_w1e"], FP, FP)], 0)
    n_w1 = jnp.concatenate([pad2(p["n_w1v"], FP, FP), pad2(p["n_w1x"], FP, FP)], 0)

    edge_params = [e_w1, pad2(p["e_b1"], 1, FP), pad2(p["e_w2"], FP, FP),
                   pad2(p["e_b2"], 1, FP), pad2(p["e_w3"], FP, FP),
                   pad2(p["e_b3"], 1, FP), pad2(p["e_g"], 1, FP),
                   pad2(p["e_bt"], 1, FP)]
    node_params = [n_w1, pad2(p["n_b1"], 1, FP), pad2(p["n_w2"], FP, FP),
                   pad2(p["n_b2"], 1, FP), pad2(p["n_w3"], FP, FP),
                   pad2(p["n_b3"], 1, FP), pad2(p["n_g"], 1, FP),
                   pad2(p["n_bt"], 1, FP)]

    tile_n = _pick_row_tile(N, row_tile)
    Tn = N // tile_n

    row_map = lambda t: (t, 0)
    const_map = lambda t: (0, 0)

    # ---- call 1: edge phase (reduction over node-row tiles, sequential) -----
    out_e, upd_e = pl.pallas_call(
        functools.partial(_edge_kernel, nedge_out),
        grid=(Tn,),
        in_specs=([pl.BlockSpec((tile_n, E_pad), row_map),      # H (h_dtype)
                   pl.BlockSpec((tile_n, FP), row_map),         # X (f32, padded)
                   pl.BlockSpec((E_pad, FP), const_map)]        # hyperedge feats
                  + [pl.BlockSpec(a.shape, const_map) for a in edge_params]),
        out_specs=(pl.BlockSpec((E_pad, FP), const_map),        # out_e (resid.)
                   pl.BlockSpec((E_pad, FP), const_map)),       # upd_e (pre-res.)
        out_shape=(jax.ShapeDtypeStruct((E_pad, FP), f32),
                   jax.ShapeDtypeStruct((E_pad, FP), h_dtype)),
        scratch_shapes=[pltpu.VMEM((E_pad, FP), f32)],          # Xe accumulator
        compiler_params=pltpu.CompilerParams(
            dimension_semantics=("arbitrary",),
            vmem_limit_bytes=vmem_limit_bytes),
    )(H, Xp, hfp, *edge_params)

    # ---- call 2: node phase (independent node-row tiles, parallel) ----------
    out_n = pl.pallas_call(
        functools.partial(_node_kernel, nnode_out),
        grid=(Tn,),
        in_specs=([pl.BlockSpec((tile_n, E_pad), row_map),      # H (h_dtype)
                   pl.BlockSpec((E_pad, FP), const_map),        # upd_e (h_dtype)
                   pl.BlockSpec((tile_n, FP), row_map)]         # X (f32, padded)
                  + [pl.BlockSpec(a.shape, const_map) for a in node_params]),
        out_specs=pl.BlockSpec((tile_n, FP), row_map),
        out_shape=jax.ShapeDtypeStruct((N, FP), f32),
        compiler_params=pltpu.CompilerParams(
            dimension_semantics=("parallel",),
            vmem_limit_bytes=vmem_limit_bytes),
    )(H, upd_e, Xp, *node_params)

    return out_n[:, :nnode_out], out_e[:E, :nedge_out]


# ----------------------------- reference (pure JAX) ---------------------------

def _layer_norm_ref(y, gamma, beta, eps=1e-5):
    mean = jnp.mean(y, axis=-1, keepdims=True)
    var = jnp.mean(jnp.square(y - mean), axis=-1, keepdims=True)
    return (y - mean) * lax.rsqrt(var + eps) * gamma + beta


def _mlp_ln_ref(x0, x1, w1a, w1b, b1, w2, b2, w3, b3, g, bt):
    h = jnp.maximum(x0 @ w1a + x1 @ w1b + b1, 0.0)
    h = jnp.maximum(h @ w2 + b2, 0.0)
    y = h @ w3 + b3
    return _layer_norm_ref(y, g, bt)


def reference_forward(X, vertices, hyperedges, hf, params, N, E):
    p = params
    Xve = X[vertices]
    Xe = jnp.zeros((E, X.shape[1]), jnp.float32).at[hyperedges].add(Xve)
    upd_e = _mlp_ln_ref(Xe, hf, p["e_w1x"], p["e_w1e"], p["e_b1"],
                        p["e_w2"], p["e_b2"], p["e_w3"], p["e_b3"],
                        p["e_g"], p["e_bt"])
    Xev = upd_e[hyperedges]
    Xv = jnp.zeros((N, upd_e.shape[1]), jnp.float32).at[vertices].add(Xev)
    upd_n = _mlp_ln_ref(Xv, X, p["n_w1v"], p["n_w1x"], p["n_b1"],
                        p["n_w2"], p["n_b2"], p["n_w3"], p["n_b3"],
                        p["n_g"], p["n_bt"])
    return upd_n + X, upd_e + hf


# ----------------------------- main --------------------------------------------

if __name__ == "__main__":
    # Module hyperparameters (residual add implies nnode_out == nnode_in etc.)
    N, E, M = 64, 16, 128            # nodes, hyperedges, incidence pairs
    nnode_in = nnode_out = 32
    nedge_in = nedge_out = 32
    hidden = 64                      # mlp_hidden_dim, nmlp_layers = 2

    key = jax.random.PRNGKey(0)
    keys = jax.random.split(key, 20)

    def lin(k, fan_in, fan_out):
        s = 1.0 / jnp.sqrt(jnp.float32(fan_in))
        return jax.random.uniform(k, (fan_in, fan_out), jnp.float32, -s, s)

    params = {
        # edge_fn: Linear(nnode_in+nedge_in -> hidden), ReLU, Linear(hidden->hidden),
        #          ReLU, Linear(hidden->nedge_out), LayerNorm(nedge_out)
        "e_w1x": lin(keys[0], nnode_in, hidden),
        "e_w1e": lin(keys[1], nedge_in, hidden),
        "e_b1": jax.random.normal(keys[2], (1, hidden), jnp.float32) * 0.01,
        "e_w2": lin(keys[3], hidden, hidden),
        "e_b2": jax.random.normal(keys[4], (1, hidden), jnp.float32) * 0.01,
        "e_w3": lin(keys[5], hidden, nedge_out),
        "e_b3": jax.random.normal(keys[6], (1, nedge_out), jnp.float32) * 0.01,
        "e_g": jnp.ones((1, nedge_out), jnp.float32),
        "e_bt": jnp.zeros((1, nedge_out), jnp.float32),
        # node_fn: Linear(nnode_in+nedge_out -> hidden), ..., LayerNorm(nnode_out)
        "n_w1v": lin(keys[7], nedge_out, hidden),
        "n_w1x": lin(keys[8], nnode_in, hidden),
        "n_b1": jax.random.normal(keys[9], (1, hidden), jnp.float32) * 0.01,
        "n_w2": lin(keys[10], hidden, hidden),
        "n_b2": jax.random.normal(keys[11], (1, hidden), jnp.float32) * 0.01,
        "n_w3": lin(keys[12], hidden, nnode_out),
        "n_b3": jax.random.normal(keys[13], (1, nnode_out), jnp.float32) * 0.01,
        "n_g": jnp.ones((1, nnode_out), jnp.float32),
        "n_bt": jnp.zeros((1, nnode_out), jnp.float32),
    }

    X = jax.random.normal(keys[14], (N, nnode_in), jnp.float32)
    hf = jax.random.normal(keys[15], (E, nedge_in), jnp.float32)
    # Ensure every node / hyperedge index appears (matches torch_scatter's
    # implicit output size = max index + 1).
    vertices = jnp.concatenate(
        [jnp.arange(N, dtype=jnp.int32),
         jax.random.randint(keys[16], (M - N,), 0, N, jnp.int32)])
    hyperedges = jnp.concatenate(
        [jnp.arange(E, dtype=jnp.int32),
         jax.random.randint(keys[17], (M - E,), 0, E, jnp.int32)])

    # row_tile=32 -> 2 node-row tiles, exercising the tiled reduction / parallel grids.
    fwd_f32 = jax.jit(lambda x, v, he, h, prm: unignn_interaction_network(
        x, v, he, h, prm, row_tile=32, h_dtype=jnp.float32))
    fwd_bf16 = jax.jit(lambda x, v, he, h, prm: unignn_interaction_network(
        x, v, he, h, prm, row_tile=32, h_dtype=jnp.bfloat16))

    ref_n, ref_e = reference_forward(X, vertices, hyperedges, hf, params, N, E)

    # Exact mode: identical math to the f32 reference.
    n32, e32 = jax.block_until_ready(fwd_f32(X, vertices, hyperedges, hf, params))
    assert jnp.allclose(n32, ref_n, atol=1e-4, rtol=1e-4)
    assert jnp.allclose(e32, ref_e, atol=1e-4, rtol=1e-4)

    # Fast (default) mode: bf16 MXU path for the gather/scatter matmuls;
    # tolerance relaxed deliberately to bf16-level accuracy.
    nbf, ebf = jax.block_until_ready(fwd_bf16(X, vertices, hyperedges, hf, params))
    assert jnp.allclose(nbf, ref_n, atol=2e-2, rtol=2e-2)
    assert jnp.allclose(ebf, ref_e, atol=2e-2, rtol=2e-2)

    print("KERNEL_OK")
</pallas_src>

<mosaic_0001>
module attributes {stable_mosaic.version = 11 : i64} {
  func.func private @main(%arg0: i32) attributes {dimension_semantics = [#tpu.dimension_semantics<core_parallel>], iteration_bounds = array<i64: 2>, tpu.core_type = #tpu.core_type<sc_scalar_subcore>, window_params = []} {
    return
  }
}

module attributes {stable_mosaic.version = 11 : i64} {
  func.func private @main(%arg0: i32) attributes {dimension_semantics = [#tpu.dimension_semantics<core_parallel>], iteration_bounds = array<i64: 2>, tpu.core_type = #tpu.core_type<sc_scalar_subcore>, window_params = []} {
    return
  }
}

module attributes {stable_mosaic.version = 11 : i64} {
  func.func @_node_kernel(%arg0: i32, %arg1: memref<32x128xf32, #tpu.memory_space<vmem>>, %arg2: memref<128x128xf32, #tpu.memory_space<vmem>>, %arg3: memref<32x128xf32, #tpu.memory_space<vmem>>, %arg4: memref<256x128xf32, #tpu.memory_space<vmem>>, %arg5: memref<1x128xf32, #tpu.memory_space<vmem>>, %arg6: memref<128x128xf32, #tpu.memory_space<vmem>>, %arg7: memref<1x128xf32, #tpu.memory_space<vmem>>, %arg8: memref<128x128xf32, #tpu.memory_space<vmem>>, %arg9: memref<1x128xf32, #tpu.memory_space<vmem>>, %arg10: memref<1x128xf32, #tpu.memory_space<vmem>>, %arg11: memref<1x128xf32, #tpu.memory_space<vmem>>, %arg12: memref<32x128xf32, #tpu.memory_space<vmem>>) attributes {dimension_semantics = [#tpu.dimension_semantics<parallel>], iteration_bounds = array<i64: 2>, scalar_prefetch = 0 : i64, scratch_operands = 0 : i64, tpu.core_type = #tpu.core_type<tc>, window_params = [{transform_indices = @transform_0, window_bounds = array<i64: 32, 128>}, {pipeline_mode = #tpu.pipeline_mode<synchronous>, transform_indices = @transform_1, window_bounds = array<i64: 128, 128>}, {transform_indices = @transform_2, window_bounds = array<i64: 32, 128>}, {pipeline_mode = #tpu.pipeline_mode<synchronous>, transform_indices = @transform_3, window_bounds = array<i64: 256, 128>}, {pipeline_mode = #tpu.pipeline_mode<synchronous>, transform_indices = @transform_4, window_bounds = array<i64: 1, 128>}, {pipeline_mode = #tpu.pipeline_mode<synchronous>, transform_indices = @transform_5, window_bounds = array<i64: 128, 128>}, {pipeline_mode = #tpu.pipeline_mode<synchronous>, transform_indices = @transform_6, window_bounds = array<i64: 1, 128>}, {pipeline_mode = #tpu.pipeline_mode<synchronous>, transform_indices = @transform_7, window_bounds = array<i64: 128, 128>}, {pipeline_mode = #tpu.pipeline_mode<synchronous>, transform_indices = @transform_8, window_bounds = array<i64: 1, 128>}, {pipeline_mode = #tpu.pipeline_mode<synchronous>, transform_indices = @transform_9, window_bounds = array<i64: 1, 128>}, {pipeline_mode = #tpu.pipeline_mode<synchronous>, transform_indices = @transform_10, window_bounds = array<i64: 1, 128>}, {transform_indices = @transform_11, window_bounds = array<i64: 32, 128>}]} {
    %c0 = arith.constant 0 : index
    %c0_0 = arith.constant 0 : index
    %0 = vector.load %arg1[%c0, %c0_0] : memref<32x128xf32, #tpu.memory_space<vmem>>, vector<32x128xf32>
    %c0_1 = arith.constant 0 : index
    %c0_2 = arith.constant 0 : index
    %1 = vector.load %arg2[%c0_1, %c0_2] : memref<128x128xf32, #tpu.memory_space<vmem>>, vector<128x128xf32>
    %cst = arith.constant dense<0.000000e+00> : vector<32x128xf32>
    %2 = tpu.matmul %0, %1, %cst {dimension_numbers = #tpu.dot_dimension_numbers<[1], [0], [0], [1], [0, 0, 1, 1], [], []>} : vector<32x128xf32>, vector<128x128xf32>, vector<32x128xf32> -> vector<32x128xf32>
    %c0_3 = arith.constant 0 : index
    %c0_4 = arith.constant 0 : index
    %3 = vector.load %arg3[%c0_3, %c0_4] : memref<32x128xf32, #tpu.memory_space<vmem>>, vector<32x128xf32>
    %4 = tpu.concatenate %2, %3 in 1 : vector<32x128xf32>, vector<32x128xf32> -> vector<32x256xf32>
    %c0_5 = arith.constant 0 : index
    %c0_6 = arith.constant 0 : index
    %5 = vector.load %arg4[%c0_5, %c0_6] : memref<256x128xf32, #tpu.memory_space<vmem>>, vector<256x128xf32>
    %cst_7 = arith.constant dense<0.000000e+00> : vector<32x128xf32>
    %6 = tpu.matmul %4, %5, %cst_7 {dimension_numbers = #tpu.dot_dimension_numbers<[1], [0], [0], [1], [0, 0, 1, 1], [], []>} : vector<32x256xf32>, vector<256x128xf32>, vector<32x128xf32> -> vector<32x128xf32>
    %c0_8 = arith.constant 0 : index
    %c0_9 = arith.constant 0 : index
    %7 = vector.load %arg5[%c0_8, %c0_9] : memref<1x128xf32, #tpu.memory_space<vmem>>, vector<1x128xf32>
    %8 = vector.broadcast %7 : vector<1x128xf32> to vector<32x128xf32>
    %9 = arith.addf %6, %8 : vector<32x128xf32>
    %cst_10 = arith.constant 0.000000e+00 : f32
    %10 = vector.broadcast %cst_10 : f32 to vector<32x128xf32>
    %11 = arith.maximumf %9, %10 : vector<32x128xf32>
    %c0_11 = arith.constant 0 : index
    %c0_12 = arith.constant 0 : index
    %12 = vector.load %arg6[%c0_11, %c0_12] : memref<128x128xf32, #tpu.memory_space<vmem>>, vector<128x128xf32>
    %cst_13 = arith.constant dense<0.000000e+00> : vector<32x128xf32>
    %13 = tpu.matmul %11, %12, %cst_13 {dimension_numbers = #tpu.dot_dimension_numbers<[1], [0], [0], [1], [0, 0, 1, 1], [], []>} : vector<32x128xf32>, vector<128x128xf32>, vector<32x128xf32> -> vector<32x128xf32>
    %c0_14 = arith.constant 0 : index
    %c0_15 = arith.constant 0 : index
    %14 = vector.load %arg7[%c0_14, %c0_15] : memref<1x128xf32, #tpu.memory_space<vmem>>, vector<1x128xf32>
    %15 = vector.broadcast %14 : vector<1x128xf32> to vector<32x128xf32>
    %16 = arith.addf %13, %15 : vector<32x128xf32>
    %cst_16 = arith.constant 0.000000e+00 : f32
    %17 = vector.broadcast %cst_16 : f32 to vector<32x128xf32>
    %18 = arith.maximumf %16, %17 : vector<32x128xf32>
    %c0_17 = arith.constant 0 : index
    %c0_18 = arith.constant 0 : index
    %19 = vector.load %arg8[%c0_17, %c0_18] : memref<128x128xf32, #tpu.memory_space<vmem>>, vector<128x128xf32>
    %cst_19 = arith.constant dense<0.000000e+00> : vector<32x128xf32>
    %20 = tpu.matmul %18, %19, %cst_19 {dimension_numbers = #tpu.dot_dimension_numbers<[1], [0], [0], [1], [0, 0, 1, 1], [], []>} : vector<32x128xf32>, vector<128x128xf32>, vector<32x128xf32> -> vector<32x128xf32>
    %c0_20 = arith.constant 0 : index
    %c0_21 = arith.constant 0 : index
    %21 = vector.load %arg9[%c0_20, %c0_21] : memref<1x128xf32, #tpu.memory_space<vmem>>, vector<1x128xf32>
    %22 = vector.broadcast %21 : vector<1x128xf32> to vector<32x128xf32>
    %23 = arith.addf %20, %22 : vector<32x128xf32>
    %c0_22 = arith.constant 0 : index
    %c0_23 = arith.constant 0 : index
    %24 = vector.load %arg10[%c0_22, %c0_23] : memref<1x128xf32, #tpu.memory_space<vmem>>, vector<1x128xf32>
    %c0_24 = arith.constant 0 : index
    %c0_25 = arith.constant 0 : index
    %25 = vector.load %arg11[%c0_24, %c0_25] : memref<1x128xf32, #tpu.memory_space<vmem>>, vector<1x128xf32>
    %26 = tpu.iota {dimensions = array<i32: 1>} : vector<1x128xi32>
    %c32_i32 = arith.constant 32 : i32
    %27 = vector.broadcast %c32_i32 : i32 to vector<1x128xi32>
    %28 = arith.cmpi slt, %26, %27 : vector<1x128xi32>
    %29 = arith.extui %28 : vector<1x128xi1> to vector<1x128xi32>
    %30 = arith.sitofp %29 : vector<1x128xi32> to vector<1x128xf32>
    %31 = vector.broadcast %30 : vector<1x128xf32> to vector<32x128xf32>
    %32 = arith.mulf %23, %31 : vector<32x128xf32>
    %cst_26 = arith.constant dense<0.000000e+00> : vector<32xf32>
    %33 = vector.multi_reduction <add>, %32, %cst_26 [1] : vector<32x128xf32> to vector<32xf32>
    %34 = vector.shape_cast %33 : vector<32xf32> to vector<32x1xf32>
    %cst_27 = arith.constant 3.125000e-02 : f32
    %35 = vector.broadcast %cst_27 : f32 to vector<32x1xf32>
    %36 = arith.mulf %34, %35 : vector<32x1xf32>
    %37 = vector.broadcast %36 : vector<32x1xf32> to vector<32x128xf32>
    %38 = arith.subf %23, %37 : vector<32x128xf32>
    %39 = vector.broadcast %30 : vector<1x128xf32> to vector<32x128xf32>
    %40 = arith.mulf %38, %39 : vector<32x128xf32>
    %41 = arith.mulf %40, %40 : vector<32x128xf32>
    %cst_28 = arith.constant dense<0.000000e+00> : vector<32xf32>
    %42 = vector.multi_reduction <add>, %41, %cst_28 [1] : vector<32x128xf32> to vector<32xf32>
    %43 = vector.shape_cast %42 : vector<32xf32> to vector<32x1xf32>
    %cst_29 = arith.constant 3.125000e-02 : f32
    %44 = vector.broadcast %cst_29 : f32 to vector<32x1xf32>
    %45 = arith.mulf %43, %44 : vector<32x1xf32>
    %cst_30 = arith.constant 9.99999974E-6 : f32
    %46 = vector.broadcast %cst_30 : f32 to vector<32x1xf32>
    %47 = arith.addf %45, %46 : vector<32x1xf32>
    %48 = math.rsqrt %47 : vector<32x1xf32>
    %49 = vector.broadcast %48 : vector<32x1xf32> to vector<32x128xf32>
    %50 = arith.mulf %40, %49 : vector<32x128xf32>
    %51 = vector.broadcast %24 : vector<1x128xf32> to vector<32x128xf32>
    %52 = arith.mulf %50, %51 : vector<32x128xf32>
    %53 = vector.broadcast %25 : vector<1x128xf32> to vector<32x128xf32>
    %54 = arith.addf %52, %53 : vector<32x128xf32>
    %55 = arith.addf %54, %3 : vector<32x128xf32>
    %c0_31 = arith.constant 0 : index
    %c0_32 = arith.constant 0 : index
    %56 = vector.load %arg12[%c0_31, %c0_32] : memref<32x128xf32, #tpu.memory_space<vmem>>, vector<32x128xf32>
    tpu.vector_store %arg12[%c0_31, %c0_32], %55 {strides = array<i32>} : memref<32x128xf32, #tpu.memory_space<vmem>>, vector<32x128xf32>,
    return
  }
  func.func @transform_0(%arg0: i32) -> (i32, i32) {
    %c0_i32 = arith.constant 0 : i32
    %c0_i32_0 = arith.constant 0 : i32
    return %arg0, %c0_i32 : i32, i32
  }
  func.func @transform_1(%arg0: i32) -> (i32, i32) {
    %c0_i32 = arith.constant 0 : i32
    %c0_i32_0 = arith.constant 0 : i32
    %c0_i32_1 = arith.constant 0 : i32
    return %c0_i32, %c0_i32_0 : i32, i32
  }
  func.func @transform_2(%arg0: i32) -> (i32, i32) {
    %c0_i32 = arith.constant 0 : i32
    %c0_i32_0 = arith.constant 0 : i32
    return %arg0, %c0_i32 : i32, i32
  }
  func.func @transform_3(%arg0: i32) -> (i32, i32) {
    %c0_i32 = arith.constant 0 : i32
    %c0_i32_0 = arith.constant 0 : i32
    %c0_i32_1 = arith.constant 0 : i32
    return %c0_i32, %c0_i32_0 : i32, i32
  }
  func.func @transform_4(%arg0: i32) -> (i32, i32) {
    %c0_i32 = arith.constant 0 : i32
    %c0_i32_0 = arith.constant 0 : i32
    %c0_i32_1 = arith.constant 0 : i32
    return %c0_i32, %c0_i32_0 : i32, i32
  }
  func.func @transform_5(%arg0: i32) -> (i32, i32) {
    %c0_i32 = arith.constant 0 : i32
    %c0_i32_0 = arith.constant 0 : i32
    %c0_i32_1 = arith.constant 0 : i32
    return %c0_i32, %c0_i32_0 : i32, i32
  }
  func.func @transform_6(%arg0: i32) -> (i32, i32) {
    %c0_i32 = arith.constant 0 : i32
    %c0_i32_0 = arith.constant 0 : i32
    %c0_i32_1 = arith.constant 0 : i32
    return %c0_i32, %c0_i32_0 : i32, i32
  }
  func.func @transform_7(%arg0: i32) -> (i32, i32) {
    %c0_i32 = arith.constant 0 : i32
    %c0_i32_0 = arith.constant 0 : i32
    %c0_i32_1 = arith.constant 0 : i32
    return %c0_i32, %c0_i32_0 : i32, i32
  }
  func.func @transform_8(%arg0: i32) -> (i32, i32) {
    %c0_i32 = arith.constant 0 : i32
    %c0_i32_0 = arith.constant 0 : i32
    %c0_i32_1 = arith.constant 0 : i32
    return %c0_i32, %c0_i32_0 : i32, i32
  }
  func.func @transform_9(%arg0: i32) -> (i32, i32) {
    %c0_i32 = arith.constant 0 : i32
    %c0_i32_0 = arith.constant 0 : i32
    %c0_i32_1 = arith.constant 0 : i32
    return %c0_i32, %c0_i32_0 : i32, i32
  }
  func.func @transform_10(%arg0: i32) -> (i32, i32) {
    %c0_i32 = arith.constant 0 : i32
    %c0_i32_0 = arith.constant 0 : i32
    %c0_i32_1 = arith.constant 0 : i32
    return %c0_i32, %c0_i32_0 : i32, i32
  }
  func.func @transform_11(%arg0: i32) -> (i32, i32) {
    %c0_i32 = arith.constant 0 : i32
    %c0_i32_0 = arith.constant 0 : i32
    return %arg0, %c0_i32 : i32, i32
  }
}

module attributes {stable_mosaic.version = 11 : i64} {
  func.func @_edge_kernel(%arg0: i32, %arg1: memref<32x128xf32, #tpu.memory_space<vmem>>, %arg2: memref<32x128xf32, #tpu.memory_space<vmem>>, %arg3: memref<128x128xf32, #tpu.memory_space<vmem>>, %arg4: memref<256x128xf32, #tpu.memory_space<vmem>>, %arg5: memref<1x128xf32, #tpu.memory_space<vmem>>, %arg6: memref<128x128xf32, #tpu.memory_space<vmem>>, %arg7: memref<1x128xf32, #tpu.memory_space<vmem>>, %arg8: memref<128x128xf32, #tpu.memory_space<vmem>>, %arg9: memref<1x128xf32, #tpu.memory_space<vmem>>, %arg10: memref<1x128xf32, #tpu.memory_space<vmem>>, %arg11: memref<1x128xf32, #tpu.memory_space<vmem>>, %arg12: memref<128x128xf32, #tpu.memory_space<vmem>>, %arg13: memref<128x128xf32, #tpu.memory_space<vmem>>, %arg14: memref<128x128xf32, #tpu.memory_space<vmem>>) attributes {dimension_semantics = [#tpu.dimension_semantics<arbitrary>], iteration_bounds = array<i64: 2>, scalar_prefetch = 0 : i64, scratch_operands = 1 : i64, tpu.core_type = #tpu.core_type<tc>, window_params = [{transform_indices = @transform_0, window_bounds = array<i64: 32, 128>}, {transform_indices = @transform_1, window_bounds = array<i64: 32, 128>}, {pipeline_mode = #tpu.pipeline_mode<synchronous>, transform_indices = @transform_2, window_bounds = array<i64: 128, 128>}, {pipeline_mode = #tpu.pipeline_mode<synchronous>, transform_indices = @transform_3, window_bounds = array<i64: 256, 128>}, {pipeline_mode = #tpu.pipeline_mode<synchronous>, transform_indices = @transform_4, window_bounds = array<i64: 1, 128>}, {pipeline_mode = #tpu.pipeline_mode<synchronous>, transform_indices = @transform_5, window_bounds = array<i64: 128, 128>}, {pipeline_mode = #tpu.pipeline_mode<synchronous>, transform_indices = @transform_6, window_bounds = array<i64: 1, 128>}, {pipeline_mode = #tpu.pipeline_mode<synchronous>, transform_indices = @transform_7, window_bounds = array<i64: 128, 128>}, {pipeline_mode = #tpu.pipeline_mode<synchronous>, transform_indices = @transform_8, window_bounds = array<i64: 1, 128>}, {pipeline_mode = #tpu.pipeline_mode<synchronous>, transform_indices = @transform_9, window_bounds = array<i64: 1, 128>}, {pipeline_mode = #tpu.pipeline_mode<synchronous>, transform_indices = @transform_10, window_bounds = array<i64: 1, 128>}, {pipeline_mode = #tpu.pipeline_mode<synchronous>, transform_indices = @transform_11, window_bounds = array<i64: 128, 128>}, {pipeline_mode = #tpu.pipeline_mode<synchronous>, transform_indices = @transform_12, window_bounds = array<i64: 128, 128>}]} {
    %c0_i32 = arith.constant 0 : i32
    %0 = arith.cmpi eq, %arg0, %c0_i32 : i32
    %1 = arith.extui %0 : i1 to i32
    %c0_i32_0 = arith.constant 0 : i32
    %2 = arith.cmpi ne, %1, %c0_i32_0 : i32
    scf.if %2 {
      %cst_9 = arith.constant 0.000000e+00 : f32
      %12 = vector.broadcast %cst_9 : f32 to vector<128x128xf32>
      %c0_10 = arith.constant 0 : index
      %c0_11 = arith.constant 0 : index
      %13 = vector.load %arg14[%c0_10, %c0_11] : memref<128x128xf32, #tpu.memory_space<vmem>>, vector<128x128xf32>
      tpu.vector_store %arg14[%c0_10, %c0_11], %12 {strides = array<i32>} : memref<128x128xf32, #tpu.memory_space<vmem>>, vector<128x128xf32>,
    } else {
    }
    %c0 = arith.constant 0 : index
    %c0_1 = arith.constant 0 : index
    %3 = vector.load %arg14[%c0, %c0_1] : memref<128x128xf32, #tpu.memory_space<vmem>>, vector<128x128xf32>
    %c0_2 = arith.constant 0 : index
    %c0_3 = arith.constant 0 : index
    %4 = vector.load %arg1[%c0_2, %c0_3] : memref<32x128xf32, #tpu.memory_space<vmem>>, vector<32x128xf32>
    %c0_4 = arith.constant 0 : index
    %c0_5 = arith.constant 0 : index
    %5 = vector.load %arg2[%c0_4, %c0_5] : memref<32x128xf32, #tpu.memory_space<vmem>>, vector<32x128xf32>
    %cst = arith.constant dense<0.000000e+00> : vector<128x128xf32>
    %6 = tpu.matmul %4, %5, %cst {dimension_numbers = #tpu.dot_dimension_numbers<[0], [0], [1], [1], [0, 1, 1, 1], [], []>} : vector<32x128xf32>, vector<32x128xf32>, vector<128x128xf32> -> vector<128x128xf32>
    %7 = arith.addf %3, %6 : vector<128x128xf32>
    %c0_6 = arith.constant 0 : index
    %c0_7 = arith.constant 0 : index
    %8 = vector.load %arg14[%c0_6, %c0_7] : memref<128x128xf32, #tpu.memory_space<vmem>>, vector<128x128xf32>
    tpu.vector_store %arg14[%c0_6, %c0_7], %7 {strides = array<i32>} : memref<128x128xf32, #tpu.memory_space<vmem>>, vector<128x128xf32>,
    %c1_i32 = arith.constant 1 : i32
    %9 = arith.cmpi eq, %arg0, %c1_i32 : i32
    %10 = arith.extui %9 : i1 to i32
    %c0_i32_8 = arith.constant 0 : i32
    %11 = arith.cmpi ne, %10, %c0_i32_8 : i32
    scf.if %11 {
      %c0_9 = arith.constant 0 : index
      %c0_10 = arith.constant 0 : index
      %12 = vector.load %arg3[%c0_9, %c0_10] : memref<128x128xf32, #tpu.memory_space<vmem>>, vector<128x128xf32>
      %c0_11 = arith.constant 0 : index
      %c0_12 = arith.constant 0 : index
      %13 = vector.load %arg14[%c0_11, %c0_12] : memref<128x128xf32, #tpu.memory_space<vmem>>, vector<128x128xf32>
      %14 = tpu.concatenate %13, %12 in 1 : vector<128x128xf32>, vector<128x128xf32> -> vector<128x256xf32>
      %c0_13 = arith.constant 0 : index
      %c0_14 = arith.constant 0 : index
      %15 = vector.load %arg4[%c0_13, %c0_14] : memref<256x128xf32, #tpu.memory_space<vmem>>, vector<256x128xf32>
      %cst_15 = arith.constant dense<0.000000e+00> : vector<128x128xf32>
      %16 = tpu.matmul %14, %15, %cst_15 {dimension_numbers = #tpu.dot_dimension_numbers<[1], [0], [0], [1], [0, 0, 1, 1], [], []>} : vector<128x256xf32>, vector<256x128xf32>, vector<128x128xf32> -> vector<128x128xf32>
      %c0_16 = arith.constant 0 : index
      %c0_17 = arith.constant 0 : index
      %17 = vector.load %arg5[%c0_16, %c0_17] : memref<1x128xf32, #tpu.memory_space<vmem>>, vector<1x128xf32>
      %18 = vector.broadcast %17 : vector<1x128xf32> to vector<128x128xf32>
      %19 = arith.addf %16, %18 : vector<128x128xf32>
      %cst_18 = arith.constant 0.000000e+00 : f32
      %20 = vector.broadcast %cst_18 : f32 to vector<128x128xf32>
      %21 = arith.maximumf %19, %20 : vector<128x128xf32>
      %c0_19 = arith.constant 0 : index
      %c0_20 = arith.constant 0 : index
      %22 = vector.load %arg6[%c0_19, %c0_20] : memref<128x128xf32, #tpu.memory_space<vmem>>, vector<128x128xf32>
      %cst_21 = arith.constant dense<0.000000e+00> : vector<128x128xf32>
      %23 = tpu.matmul %21, %22, %cst_21 {dimension_numbers = #tpu.dot_dimension_numbers<[1], [0], [0], [1], [0, 0, 1, 1], [], []>} : vector<128x128xf32>, vector<128x128xf32>, vector<128x128xf32> -> vector<128x128xf32>
      %c0_22 = arith.constant 0 : index
      %c0_23 = arith.constant 0 : index
      %24 = vector.load %arg7[%c0_22, %c0_23] : memref<1x128xf32, #tpu.memory_space<vmem>>, vector<1x128xf32>
      %25 = vector.broadcast %24 : vector<1x128xf32> to vector<128x128xf32>
      %26 = arith.addf %23, %25 : vector<128x128xf32>
      %cst_24 = arith.constant 0.000000e+00 : f32
      %27 = vector.broadcast %cst_24 : f32 to vector<128x128xf32>
      %28 = arith.maximumf %26, %27 : vector<128x128xf32>
      %c0_25 = arith.constant 0 : index
      %c0_26 = arith.constant 0 : index
      %29 = vector.load %arg8[%c0_25, %c0_26] : memref<128x128xf32, #tpu.memory_space<vmem>>, vector<128x128xf32>
      %cst_27 = arith.constant dense<0.000000e+00> : vector<128x128xf32>
      %30 = tpu.matmul %28, %29, %cst_27 {dimension_numbers = #tpu.dot_dimension_numbers<[1], [0], [0], [1], [0, 0, 1, 1], [], []>} : vector<128x128xf32>, vector<128x128xf32>, vector<128x128xf32> -> vector<128x128xf32>
      %c0_28 = arith.constant 0 : index
      %c0_29 = arith.constant 0 : index
      %31 = vector.load %arg9[%c0_28, %c0_29] : memref<1x128xf32, #tpu.memory_space<vmem>>, vector<1x128xf32>
      %32 = vector.broadcast %31 : vector<1x128xf32> to vector<128x128xf32>
      %33 = arith.addf %30, %32 : vector<128x128xf32>
      %c0_30 = arith.constant 0 : index
      %c0_31 = arith.constant 0 : index
      %34 = vector.load %arg10[%c0_30, %c0_31] : memref<1x128xf32, #tpu.memory_space<vmem>>, vector<1x128xf32>
      %c0_32 = arith.constant 0 : index
      %c0_33 = arith.constant 0 : index
      %35 = vector.load %arg11[%c0_32, %c0_33] : memref<1x128xf32, #tpu.memory_space<vmem>>, vector<1x128xf32>
      %36 = tpu.iota {dimensions = array<i32: 1>} : vector<1x128xi32>
      %c32_i32 = arith.constant 32 : i32
      %37 = vector.broadcast %c32_i32 : i32 to vector<1x128xi32>
      %38 = arith.cmpi slt, %36, %37 : vector<1x128xi32>
      %39 = arith.extui %38 : vector<1x128xi1> to vector<1x128xi32>
      %40 = arith.sitofp %39 : vector<1x128xi32> to vector<1x128xf32>
      %41 = vector.broadcast %40 : vector<1x128xf32> to vector<128x128xf32>
      %42 = arith.mulf %33, %41 : vector<128x128xf32>
      %cst_34 = arith.constant dense<0.000000e+00> : vector<128xf32>
      %43 = vector.multi_reduction <add>, %42, %cst_34 [1] : vector<128x128xf32> to vector<128xf32>
      %44 = vector.shape_cast %43 : vector<128xf32> to vector<128x1xf32>
      %cst_35 = arith.constant 3.125000e-02 : f32
      %45 = vector.broadcast %cst_35 : f32 to vector<128x1xf32>
      %46 = arith.mulf %44, %45 : vector<128x1xf32>
      %47 = vector.broadcast %46 : vector<128x1xf32> to vector<128x128xf32>
      %48 = arith.subf %33, %47 : vector<128x128xf32>
      %49 = vector.broadcast %40 : vector<1x128xf32> to vector<128x128xf32>
      %50 = arith.mulf %48, %49 : vector<128x128xf32>
      %51 = arith.mulf %50, %50 : vector<128x128xf32>
      %cst_36 = arith.constant dense<0.000000e+00> : vector<128xf32>
      %52 = vector.multi_reduction <add>, %51, %cst_36 [1] : vector<128x128xf32> to vector<128xf32>
      %53 = vector.shape_cast %52 : vector<128xf32> to vector<128x1xf32>
      %cst_37 = arith.constant 3.125000e-02 : f32
      %54 = vector.broadcast %cst_37 : f32 to vector<128x1xf32>
      %55 = arith.mulf %53, %54 : vector<128x1xf32>
      %cst_38 = arith.constant 9.99999974E-6 : f32
      %56 = vector.broadcast %cst_38 : f32 to vector<128x1xf32>
      %57 = arith.addf %55, %56 : vector<128x1xf32>
      %58 = math.rsqrt %57 : vector<128x1xf32>
      %59 = vector.broadcast %58 : vector<128x1xf32> to vector<128x128xf32>
      %60 = arith.mulf %50, %59 : vector<128x128xf32>
      %61 = vector.broadcast %34 : vector<1x128xf32> to vector<128x128xf32>
      %62 = arith.mulf %60, %61 : vector<128x128xf32>
      %63 = vector.broadcast %35 : vector<1x128xf32> to vector<128x128xf32>
      %64 = arith.addf %62, %63 : vector<128x128xf32>
      %c0_39 = arith.constant 0 : index
      %c0_40 = arith.constant 0 : index
      %65 = vector.load %arg13[%c0_39, %c0_40] : memref<128x128xf32, #tpu.memory_space<vmem>>, vector<128x128xf32>
      tpu.vector_store %arg13[%c0_39, %c0_40], %64 {strides = array<i32>} : memref<128x128xf32, #tpu.memory_space<vmem>>, vector<128x128xf32>,
      %66 = arith.addf %64, %12 : vector<128x128xf32>
      %c0_41 = arith.constant 0 : index
      %c0_42 = arith.constant 0 : index
      %67 = vector.load %arg12[%c0_41, %c0_42] : memref<128x128xf32, #tpu.memory_space<vmem>>, vector<128x128xf32>
      tpu.vector_store %arg12[%c0_41, %c0_42], %66 {strides = array<i32>} : memref<128x128xf32, #tpu.memory_space<vmem>>, vector<128x128xf32>,
    } else {
    }
    return
  }
  func.func @transform_0(%arg0: i32) -> (i32, i32) {
    %c0_i32 = arith.constant 0 : i32
    %c0_i32_0 = arith.constant 0 : i32
    return %arg0, %c0_i32 : i32, i32
  }
  func.func @transform_1(%arg0: i32) -> (i32, i32) {
    %c0_i32 = arith.constant 0 : i32
    %c0_i32_0 = arith.constant 0 : i32
    return %arg0, %c0_i32 : i32, i32
  }
  func.func @transform_2(%arg0: i32) -> (i32, i32) {
    %c0_i32 = arith.constant 0 : i32
    %c0_i32_0 = arith.constant 0 : i32
    %c0_i32_1 = arith.constant 0 : i32
    return %c0_i32, %c0_i32_0 : i32, i32
  }
  func.func @transform_3(%arg0: i32) -> (i32, i32) {
    %c0_i32 = arith.constant 0 : i32
    %c0_i32_0 = arith.constant 0 : i32
    %c0_i32_1 = arith.constant 0 : i32
    return %c0_i32, %c0_i32_0 : i32, i32
  }
  func.func @transform_4(%arg0: i32) -> (i32, i32) {
    %c0_i32 = arith.constant 0 : i32
    %c0_i32_0 = arith.constant 0 : i32
    %c0_i32_1 = arith.constant 0 : i32
    return %c0_i32, %c0_i32_0 : i32, i32
  }
  func.func @transform_5(%arg0: i32) -> (i32, i32) {
    %c0_i32 = arith.constant 0 : i32
    %c0_i32_0 = arith.constant 0 : i32
    %c0_i32_1 = arith.constant 0 : i32
    return %c0_i32, %c0_i32_0 : i32, i32
  }
  func.func @transform_6(%arg0: i32) -> (i32, i32) {
    %c0_i32 = arith.constant 0 : i32
    %c0_i32_0 = arith.constant 0 : i32
    %c0_i32_1 = arith.constant 0 : i32
    return %c0_i32, %c0_i32_0 : i32, i32
  }
  func.func @transform_7(%arg0: i32) -> (i32, i32) {
    %c0_i32 = arith.constant 0 : i32
    %c0_i32_0 = arith.constant 0 : i32
    %c0_i32_1 = arith.constant 0 : i32
    return %c0_i32, %c0_i32_0 : i32, i32
  }
  func.func @transform_8(%arg0: i32) -> (i32, i32) {
    %c0_i32 = arith.constant 0 : i32
    %c0_i32_0 = arith.constant 0 : i32
    %c0_i32_1 = arith.constant 0 : i32
    return %c0_i32, %c0_i32_0 : i32, i32
  }
  func.func @transform_9(%arg0: i32) -> (i32, i32) {
    %c0_i32 = arith.constant 0 : i32
    %c0_i32_0 = arith.constant 0 : i32
    %c0_i32_1 = arith.constant 0 : i32
    return %c0_i32, %c0_i32_0 : i32, i32
  }
  func.func @transform_10(%arg0: i32) -> (i32, i32) {
    %c0_i32 = arith.constant 0 : i32
    %c0_i32_0 = arith.constant 0 : i32
    %c0_i32_1 = arith.constant 0 : i32
    return %c0_i32, %c0_i32_0 : i32, i32
  }
  func.func @transform_11(%arg0: i32) -> (i32, i32) {
    %c0_i32 = arith.constant 0 : i32
    %c0_i32_0 = arith.constant 0 : i32
    %c0_i32_1 = arith.constant 0 : i32
    return %c0_i32, %c0_i32_0 : i32, i32
  }
  func.func @transform_12(%arg0: i32) -> (i32, i32) {
    %c0_i32 = arith.constant 0 : i32
    %c0_i32_0 = arith.constant 0 : i32
    %c0_i32_1 = arith.constant 0 : i32
    return %c0_i32, %c0_i32_0 : i32, i32
  }
}

</mosaic_0001>

<bundles_post_ra>
// kernel: _lambda_.3
= control target key start
LH: loop header
LB: loop body
LE: loop exit
PB: predicated region body
PF: predicated region fallthrough
CT: control target
= control target key end

     0   :  { %s1347_s17 = smov 0   ;;  %s1655_s0 = inlined_call_operand.vmem [shape: f32[64,128], index: 0, kind: input, shape index: {}]   ;;  %s1656_s1 = inlined_call_operand.vmem [shape: f32[128,128], index: 1, kind: input, shape index: {}]   ;;  %s1657_s2 = inlined_call_operand.vmem [shape: f32[64,128], index: 2, kind: input, shape index: {}]   ;;  %s1658_s3 = inlined_call_operand.vmem [shape: f32[256,128], index: 3, kind: input, shape index: {}]   ;;  %s1659_s4 = inlined_call_operand.vmem [shape: f32[1,128], index: 4, kind: input, shape index: {}]   ;;  %s1660_s5 = inlined_call_operand.vmem [shape: f32[128,128], index: 5, kind: input, shape index: {}]   ;;  %s1661_s6 = inlined_call_operand.vmem [shape: f32[1,128], index: 6, kind: input, shape index: {}]   ;;  %s1662_s7 = inlined_call_operand.vmem [shape: f32[128,128], index: 7, kind: input, shape index: {}]   ;;  %s1663_s8 = inlined_call_operand.vmem [shape: f32[1,128], index: 8, kind: input, shape index: {}]   ;;  %s1664_s9 = inlined_call_operand.vmem [shape: f32[1,128], index: 9, kind: input, shape index: {}]   ;;  %s1665_s10 = inlined_call_operand.vmem [shape: f32[1,128], index: 10, kind: input, shape index: {}]   ;;  %s1666_s11 = inlined_call_operand.vmem [shape: f32[64,128], index: 11, kind: output, shape index: {}]  }
   0x1 LB: > { %s1024_s18 = sadd.s32 4294967295, %s1284_s17   ;;  %p1028_p0 = scmp.ge.s32.totalorder %s1284_s17, 1  ;;  %s1284_s17 = sphi %s1347_s17, %s21_s17  }
   0x2   : > { %p349_p1 = scmp.lt.s32.totalorder %s1284_s17, 3 }
   0x4   : > { %p350_p2 = pnand %p1028_p0, %p349_p1 }
   0x5   : > { %s1029_s23 = sshll.u32 (!%p350_p2), %s1024_s18, 2 }
   0x6   : > { %353 = sbr.rel (%p350_p2) target bundleno = 1166 (0x48e), region = 64  ;;  %p395_p3 = scmp.lt.s32.totalorder (!%p350_p2), %s1029_s23, 7 }
   0xb   : > { %v431_v0 = vld [vmem:[%s1656_s1 + $0x78] sm:$0xff]  ;;  %v430_v1 = vld [vmem:[%s1656_s1 + $0x70] sm:$0xff]  ;;  %v429_v2 = vld [vmem:[%s1656_s1 + $0x68] sm:$0xff]  ;;  %s1668_s23 = smov (!%p395_p3, %s1029_s23), 7 }
   0xc   : > { %1147 = vmatprep.subr.mxu0 %v431_v0  ;;  %v428_v3 = vld [vmem:[%s1656_s1 + $0x60] sm:$0xff]  ;;  %s1367_s28 = sshll.u32 %s1668_s23, 3  ;;  %v552_v4 = vld [vmem:[%s1658_s3 + $0xf8] sm:$0xff]  ;;  %v551_v7 = vld [vmem:[%s1658_s3 + $0xf0] sm:$0xff] }
   0xd   : > { %1148 = vmatpush3.msra.mxu0 %v431_v0  ;;  %v536_v5 = vld [vmem:[%s1658_s3 + $0x78] sm:$0xff]  ;;  %s1382_s19 = scalar_lea.vmem %s1655_s0, %s1367_s28  ;;  %1063 = vmatprep.subr.mxu1 %v552_v4  ;;  %v535_v9 = vld [vmem:[%s1658_s3 + $0x70] sm:$0xff]  ;;  %v550_v11 = vld [vmem:[%s1658_s3 + $0xe8] sm:$0xff]  ;;  %s1512_s22 = scalar_lea.vmem %s1657_s2, %s1367_s28 }
   0xe   : > { %1149 = vmatprep.subr.mxu0 %v430_v1  ;;  %v427_v6 = vld [vmem:[%s1656_s1 + $0x58] sm:$0xff]  ;;  %v412_v8 = vld [vmem:[%s1382_s19] sm:$0xff]  ;;  %1064 = vmatpush3.msra.mxu1 %v536_v5  ;;  %v426_v10 = vld [vmem:[%s1656_s1 + $0x50] sm:$0xff] }
   0xf   : > { %1150 = vmatpush3.msra.mxu0 %v430_v1  ;;  %1179 = vmatprep.mubr.f32.mxu0 %v412_v8  ;;  %v534_v12 = vld [vmem:[%s1658_s3 + $0x68] sm:$0xff]  ;;  %v549_v14 = vld [vmem:[%s1658_s3 + $0xe0] sm:$0xff]  ;;  %v548_v17 = vld [vmem:[%s1658_s3 + $0xd8] sm:$0xff] }
  0x10   : > { %1151 = vmatprep.subr.mxu0 %v429_v2  ;;  %1065 = vmatprep.subr.mxu1 %v551_v7  ;;  %v425_v13 = vld [vmem:[%s1656_s1 + $0x48] sm:$0xff]  ;;  %v533_v15 = vld [vmem:[%s1658_s3 + $0x60] sm:$0xff]  ;;  %v532_v18 = vld [vmem:[%s1658_s3 + $0x58] sm:$0xff] }
  0x11   : > { %1152 = vmatpush3.msra.mxu0 %v429_v2  ;;  %1066 = vmatpush3.msra.mxu1 %v535_v9  ;;  %v424_v16 = vld [vmem:[%s1656_s1 + $0x40] sm:$0xff]  ;;  %v423_v19 = vld [vmem:[%s1656_s1 + $0x38] sm:$0xff]  ;;  %v547_v20 = vld [vmem:[%s1658_s3 + $0xd0] sm:$0xff] }
  0x12   : > { %1153 = vmatprep.subr.mxu0 %v428_v3  ;;  %1067 = vmatprep.subr.mxu1 %v550_v11  ;;  %v531_v21 = vld [vmem:[%s1658_s3 + $0x50] sm:$0xff]  ;;  %v546_v23 = vld [vmem:[%s1658_s3 + $0xc8] sm:$0xff]  ;;  %v545_v26 = vld [vmem:[%s1658_s3 + $0xc0] sm:$0xff] }
  0x13   : > { %1154 = vmatpush3.msra.mxu0 %v428_v3  ;;  %1068 = vmatpush3.msra.mxu1 %v534_v12  ;;  %v422_v22 = vld [vmem:[%s1656_s1 + $0x30] sm:$0xff]  ;;  %v530_v24 = vld [vmem:[%s1658_s3 + $0x48] sm:$0xff]  ;;  %v529_v27 = vld [vmem:[%s1658_s3 + $0x40] sm:$0xff] }
  0x14   : > { %1155 = vmatprep.subr.mxu0 %v427_v6  ;;  %1069 = vmatprep.subr.mxu1 %v549_v14  ;;  %v421_v25 = vld [vmem:[%s1656_s1 + $0x28] sm:$0xff]  ;;  %v420_v28 = vld [vmem:[%s1656_s1 + $0x20] sm:$0xff]  ;;  %v544_v29 = vld [vmem:[%s1658_s3 + $0xb8] sm:$0xff] }
  0x15   : > { %1156 = vmatpush3.msra.mxu0 %v427_v6  ;;  %1070 = vmatpush3.msra.mxu1 %v533_v15  ;;  %v528_v30 = vld [vmem:[%s1658_s3 + $0x38] sm:$0xff]  ;;  %v543_v32 = vld [vmem:[%s1658_s3 + $0xb0] sm:$0xff]  ;;  %v542_v35 = vld [vmem:[%s1658_s3 + $0xa8] sm:$0xff] }
  0x16   : > { %1157 = vmatprep.subr.mxu0 %v426_v10  ;;  %1071 = vmatprep.subr.mxu1 %v548_v17  ;;  %v419_v31 = vld [vmem:[%s1656_s1 + $0x18] sm:$0xff]  ;;  %v527_v33 = vld [vmem:[%s1658_s3 + $0x30] sm:$0xff]  ;;  %v526_v36 = vld [vmem:[%s1658_s3 + $0x28] sm:$0xff] }
  0x17   : > { %1158 = vmatpush3.msra.mxu0 %v426_v10  ;;  %1072 = vmatpush3.msra.mxu1 %v532_v18  ;;  %v418_v34 = vld [vmem:[%s1656_s1 + $0x10] sm:$0xff]  ;;  %v417_v37 = vld [vmem:[%s1656_s1 + $0x8] sm:$0xff]  ;;  %v541_v38 = vld [vmem:[%s1658_s3 + $0xa0] sm:$0xff] }
  0x18   : > { %1159 = vmatprep.subr.mxu0 %v425_v13  ;;  %1073 = vmatprep.subr.mxu1 %v547_v20  ;;  %v525_v39 = vld [vmem:[%s1658_s3 + $0x20] sm:$0xff]  ;;  %v540_v41 = vld [vmem:[%s1658_s3 + $0x98] sm:$0xff]  ;;  %v413_v43 = vld [vmem:[%s1382_s19 + $0x8] sm:$0xff] }
  0x19   : > { %1160 = vmatpush3.msra.mxu0 %v425_v13  ;;  %1074 = vmatpush3.msra.mxu1 %v531_v21  ;;  %v416_v40 = vld [vmem:[%s1656_s1] sm:$0xff]  ;;  %v524_v42 = vld [vmem:[%s1658_s3 + $0x18] sm:$0xff]  ;;  %v539_v44 = vld [vmem:[%s1658_s3 + $0x90] sm:$0xff] }
  0x1a   : > { %1161 = vmatprep.subr.mxu0 %v424_v16  ;;  %1075 = vmatprep.subr.mxu1 %v546_v23  ;;  %v414_v45 = vld [vmem:[%s1382_s19 + $0x10] sm:$0xff]  ;;  %v538_v47 = vld [vmem:[%s1658_s3 + $0x88] sm:$0xff]  ;;  %v415_v48 = vld [vmem:[%s1382_s19 + $0x18] sm:$0xff] }
  0x1b   : > { %1162 = vmatpush3.msra.mxu0 %v424_v16  ;;  %1076 = vmatpush3.msra.mxu1 %v530_v24  ;;  %v523_v46 = vld [vmem:[%s1658_s3 + $0x10] sm:$0xff]  ;;  %v522_v49 = vld [vmem:[%s1658_s3 + $0x8] sm:$0xff]  ;;  %v537_v50 = vld [vmem:[%s1658_s3 + $0x80] sm:$0xff] }
  0x1c   : > { %1163 = vmatprep.subr.mxu0 %v423_v19  ;;  %1077 = vmatprep.subr.mxu1 %v545_v26  ;;  %v521_v51 = vld [vmem:[%s1658_s3] sm:$0xff]  ;;  %v664_v53 = vld [vmem:[%s1660_s5 + $0x78] sm:$0xff]  ;;  %v663_v54 = vld [vmem:[%s1660_s5 + $0x70] sm:$0xff] }
  0x1d   : > { %1164 = vmatpush3.msra.mxu0 %v423_v19  ;;  %1078 = vmatpush3.msra.mxu1 %v529_v27  ;;  %v1518_v52 = vld [vmem:[%s1512_s22] sm:$0xff]  ;;  %v662_v55 = vld [vmem:[%s1660_s5 + $0x68] sm:$0xff]  ;;  %v660_v57 = vld [vmem:[%s1660_s5 + $0x58] sm:$0xff] }
  0x1e   : > { %1165 = vmatprep.subr.mxu0 %v422_v22  ;;  %1079 = vmatprep.subr.mxu1 %v544_v29  ;;  %v661_v56 = vld [vmem:[%s1660_s5 + $0x60] sm:$0xff]  ;;  %v659_v58 = vld [vmem:[%s1660_s5 + $0x50] sm:$0xff]  ;;  %v658_v59 = vld [vmem:[%s1660_s5 + $0x48] sm:$0xff] }
  0x1f   : > { %1166 = vmatpush3.msra.mxu0 %v422_v22  ;;  %1080 = vmatpush3.msra.mxu1 %v528_v30  ;;  %v657_v60 = vld [vmem:[%s1660_s5 + $0x40] sm:$0xff]  ;;  %v656_v61 = vld [vmem:[%s1660_s5 + $0x38] sm:$0xff]  ;;  %v655_v62 = vld [vmem:[%s1660_s5 + $0x30] sm:$0xff] }
  0x20   : > { %1167 = vmatprep.subr.mxu0 %v421_v25  ;;  %1081 = vmatprep.subr.mxu1 %v543_v32  ;;  %v1552_v0 = vld [vmem:[%s1512_s22 + $0x8] sm:$0xff]  ;;  %v1556_v2 = vld [vmem:[%s1512_s22 + $0x10] sm:$0xff]  ;;  %v1560_v4 = vld [vmem:[%s1512_s22 + $0x18] sm:$0xff]  ;;  %s410_s22 = scalar_lea.vmem %s1666_s11, %s1367_s28 }
  0x21   : > { %1168 = vmatpush3.msra.mxu0 %v421_v25  ;;  %1082 = vmatpush3.msra.mxu1 %v527_v33  ;;  %v654_v6 = vld [vmem:[%s1660_s5 + $0x28] sm:$0xff]  ;;  %v653_v7 = vld [vmem:[%s1660_s5 + $0x20] sm:$0xff]  ;;  %v652_v8 = vld [vmem:[%s1660_s5 + $0x18] sm:$0xff] }
  0x22   : > { %1169 = vmatprep.subr.mxu0 %v420_v28  ;;  %1083 = vmatprep.subr.mxu1 %v542_v35  ;;  %v651_v9 = vld [vmem:[%s1660_s5 + $0x10] sm:$0xff]  ;;  %v650_v10 = vld [vmem:[%s1660_s5 + $0x8] sm:$0xff]  ;;  %v649_v11 = vld [vmem:[%s1660_s5] sm:$0xff] }
  0x23   : > { %1170 = vmatpush3.msra.mxu0 %v420_v28  ;;  %1084 = vmatpush3.msra.mxu1 %v526_v36  ;;  %v776_v12 = vld [vmem:[%s1662_s7 + $0x78] sm:$0xff]  ;;  %v775_v13 = vld [vmem:[%s1662_s7 + $0x70] sm:$0xff]  ;;  %v774_v14 = vld [vmem:[%s1662_s7 + $0x68] sm:$0xff] }
  0x24   : > { %1171 = vmatprep.subr.mxu0 %v419_v31  ;;  %1085 = vmatprep.subr.mxu1 %v541_v38  ;;  %v773_v15 = vld [vmem:[%s1662_s7 + $0x60] sm:$0xff]  ;;  %v772_v16 = vld [vmem:[%s1662_s7 + $0x58] sm:$0xff]  ;;  %v771_v17 = vld [vmem:[%s1662_s7 + $0x50] sm:$0xff] }
  0x25   : > { %1172 = vmatpush3.msra.mxu0 %v419_v31  ;;  %1086 = vmatpush3.msra.mxu1 %v525_v39  ;;  %v770_v18 = vld [vmem:[%s1662_s7 + $0x48] sm:$0xff]  ;;  %v769_v19 = vld [vmem:[%s1662_s7 + $0x40] sm:$0xff]  ;;  %v768_v20 = vld [vmem:[%s1662_s7 + $0x38] sm:$0xff] }
  0x26   : > { %1173 = vmatprep.subr.mxu0 %v418_v34  ;;  %1087 = vmatprep.subr.mxu1 %v540_v41  ;;  %v767_v21 = vld [vmem:[%s1662_s7 + $0x30] sm:$0xff]  ;;  %v766_v22 = vld [vmem:[%s1662_s7 + $0x28] sm:$0xff]  ;;  %v765_v23 = vld [vmem:[%s1662_s7 + $0x20] sm:$0xff] }
  0x27   : > { %1174 = vmatpush3.msra.mxu0 %v418_v34  ;;  %1088 = vmatpush3.msra.mxu1 %v524_v42  ;;  %v1035_v25 = vld [vmem:[%s1659_s4] ss:$0 sm:$0xff] }
  0x28   : > { %1175 = vmatprep.subr.mxu0 %v417_v37  ;;  %1089 = vmatprep.subr.mxu1 %v539_v44 }
  0x29   : > { %1176 = vmatpush3.msra.mxu0 %v417_v37  ;;  %1090 = vmatpush3.msra.mxu1 %v523_v46  ;;  %v763_v46 = vld [vmem:[%s1662_s7 + $0x10] sm:$0xff] }
  0x2a   : > { %1177 = vmatprep.subr.mxu0 %v416_v40  ;;  %1091 = vmatprep.subr.mxu1 %v538_v47  ;;  %v762_v47 = vld [vmem:[%s1662_s7 + $0x8] sm:$0xff] }
  0x2b   : > { %1178 = vmatpush3.msra.mxu0 %v416_v40  ;;  %1092 = vmatpush3.msra.mxu1 %v522_v49  ;;  %v1036_v49 = vld [vmem:[%s1661_s6] ss:$0 sm:$0xff] }
  0x2c   : > { %1180 = vmatmul.mubr.f32.vlgmr.msra.gmra.mxu0 %v413_v43  ;;  %1093 = vmatprep.subr.mxu1 %v537_v50 }
  0x2d   : > { %1182 = vmatprep.mubr.f32.mxu0 %v414_v45  ;;  %1094 = vmatpush3.msra.mxu1 %v521_v51  ;;  %v764_v45 = vld [vmem:[%s1662_s7 + $0x18] sm:$0xff] }
  0x2e   : > { %624 = vmatprep.mubr.f32.mxu1 %v1518_v52  ;;  %1185 = vmatprep.subr.mxu0 %v664_v53 }
  0x2f   : > { %1186 = vmatpush3.msra.mxu0 %v664_v53  ;;  %1223 = vmatprep.subr.mxu1 %v776_v12 }
  0x30   : > { %1183 = vmatmul.mubr.f32.gmra.mxu0 %v415_v48  ;;  %1187 = vmatprep.subr.mxu0 %v663_v54  ;;  %v761_v48 = vld [vmem:[%s1662_s7] sm:$0xff] }
  0x31   : > { %1188 = vmatpush3.msra.mxu0 %v663_v54 }
  0x32   : > { %1189 = vmatprep.subr.mxu0 %v662_v55 }
  0x33   : > { %1190 = vmatpush3.msra.mxu0 %v662_v55 }
  0x34   : > { %1191 = vmatprep.subr.mxu0 %v661_v56 }
  0x35   : > { %1192 = vmatpush3.msra.mxu0 %v661_v56 }
  0x36   : > { %1193 = vmatprep.subr.mxu0 %v660_v57 }
  0x37   : > { %1194 = vmatpush3.msra.mxu0 %v660_v57 }
  0x38   : > { %1195 = vmatprep.subr.mxu0 %v659_v58 }
  0x39   : > { %1196 = vmatpush3.msra.mxu0 %v659_v58 }
  0x3a   : > { %1197 = vmatprep.subr.mxu0 %v658_v59 }
  0x3b   : > { %1198 = vmatpush3.msra.mxu0 %v658_v59 }
  0x3c   : > { %1199 = vmatprep.subr.mxu0 %v657_v60 }
  0x3d   : > { %1200 = vmatpush3.msra.mxu0 %v657_v60 }
  0x3e   : > { %1201 = vmatprep.subr.mxu0 %v656_v61 }
  0x3f   : > { %1202 = vmatpush3.msra.mxu0 %v656_v61 }
  0x40   : > { %1203 = vmatprep.subr.mxu0 %v655_v62 }
  0x41   : > { %1204 = vmatpush3.msra.mxu0 %v655_v62 }
  0x42   : > { %1205 = vmatprep.subr.mxu0 %v654_v6 }
  0x43   : > { %1206 = vmatpush3.msra.mxu0 %v654_v6 }
  0x44   : > { %1207 = vmatprep.subr.mxu0 %v653_v7 }
  0x45   : > { %1208 = vmatpush3.msra.mxu0 %v653_v7 }
  0x46   : > { %1209 = vmatprep.subr.mxu0 %v652_v8 }
  0x47   : > { %1210 = vmatpush3.msra.mxu0 %v652_v8  ;;  %v1286_v8 = vmov 0.0  }
  0x48   : > { %1211 = vmatprep.subr.mxu0 %v651_v9 }
  0x49   : > { %1212 = vmatpush3.msra.mxu0 %v651_v9 }
  0x4a   : > { %1213 = vmatprep.subr.mxu0 %v650_v10 }
  0x4b   : > { %1214 = vmatpush3.msra.mxu0 %v650_v10 }
  0x4c   : > { %1215 = vmatprep.subr.mxu0 %v649_v11 }
  0x4d   : > { %1216 = vmatpush3.msra.mxu0 %v649_v11 }
  0xec   : > { %v1181_v63 = vpop.f32.mrf.mxu0 }
  0xee   : > { %v498_v1 = vpop.f32.mrf.mxu0 }
  0xef   : > { %625 = vmatmul.mubr.f32.vlgmr.msra.gmra.mxu1 %v498_v1 }
  0xf0   : > { %629 = vmatprep.mubr.f32.mxu1 %v1552_v0  ;;  %v1184_v3 = vpop.f32.mrf.mxu0  ;;  %1224 = vmatpush3.msra.mxu1 %v776_v12 }
  0xf1   : > { %1225 = vmatprep.subr.mxu1 %v775_v13 }
  0xf2   : > { %v508_v5 = vpop.f32.mrf.mxu0  ;;  %1226 = vmatpush3.msra.mxu1 %v775_v13 }
  0xf3   : > { %630 = vmatmul.mubr.f32.gmra.mxu1 %v1181_v63  ;;  %1227 = vmatprep.subr.mxu1 %v774_v14  ;;  %v871_v63 = vlaneseq }
  0xf4   : > { %634 = vmatprep.mubr.f32.mxu1 %v1556_v2  ;;  %1228 = vmatpush3.msra.mxu1 %v774_v14 }
  0xf5   : > { %1229 = vmatprep.subr.mxu1 %v773_v15  ;;  %v872_v1 = vand.u32 127, %v871_v63 }
  0xf6   : > { %1230 = vmatpush3.msra.mxu1 %v773_v15 }
  0xf7   : > { %635 = vmatmul.mubr.f32.gmra.mxu1 %v508_v5  ;;  %1231 = vmatprep.subr.mxu1 %v772_v16  ;;  %vm873_vm0 = vcmp.lt.s32.totalorder %v872_v1, 32  ;;  %v1037_v5 = vld [vmem:[%s1663_s8] ss:$0 sm:$0xff] }
  0xf8   : > { %639 = vmatprep.mubr.f32.mxu1 %v1560_v4  ;;  %1232 = vmatpush3.msra.mxu1 %v772_v16  ;;  %v1038_v9 = vsel %vm873_vm0, 1.0, %v1286_v8 }
  0xf9   : > { %1233 = vmatprep.subr.mxu1 %v771_v17 }
  0xfa   : > { %1234 = vmatpush3.msra.mxu1 %v771_v17 }
  0xfb   : > { %640 = vmatmul.mubr.f32.gmra.mxu1 %v1184_v3  ;;  %1235 = vmatprep.subr.mxu1 %v770_v18 }
  0xfc   : > { %1236 = vmatpush3.msra.mxu1 %v770_v18 }
  0xfd   : > { %1237 = vmatprep.subr.mxu1 %v769_v19 }
  0xfe   : > { %1238 = vmatpush3.msra.mxu1 %v769_v19 }
  0xff   : > { %1239 = vmatprep.subr.mxu1 %v768_v20 }
 0x100   : > { %1240 = vmatpush3.msra.mxu1 %v768_v20 }
 0x101   : > { %1241 = vmatprep.subr.mxu1 %v767_v21 }
 0x102   : > { %1242 = vmatpush3.msra.mxu1 %v767_v21 }
 0x103   : > { %1243 = vmatprep.subr.mxu1 %v766_v22 }
 0x104   : > { %1244 = vmatpush3.msra.mxu1 %v766_v22 }
 0x105   : > { %1245 = vmatprep.subr.mxu1 %v765_v23 }
 0x106   : > { %1246 = vmatpush3.msra.mxu1 %v765_v23 }
 0x107   : > { %1247 = vmatprep.subr.mxu1 %v764_v45 }
 0x108   : > { %1248 = vmatpush3.msra.mxu1 %v764_v45 }
 0x109   : > { %1249 = vmatprep.subr.mxu1 %v763_v46 }
 0x10a   : > { %1250 = vmatpush3.msra.mxu1 %v763_v46 }
 0x10b   : > { %1251 = vmatprep.subr.mxu1 %v762_v47 }
 0x10c   : > { %1252 = vmatpush3.msra.mxu1 %v762_v47 }
 0x10d   : > { %1253 = vmatprep.subr.mxu1 %v761_v48 }
 0x10e   : > { %1254 = vmatpush3.msra.mxu1 %v761_v48 }
 0x1af   : > { %v1095_v24 = vpop.f32.mrf.mxu1 }
 0x1b1   : > { %v1096_v26 = vpop.f32.mrf.mxu1 }
 0x1b2   : > { %v1097_v27 = vadd.f32 %v1096_v26, %v1095_v24 }
 0x1b3   : > { %v1098_v28 = vpop.f32.mrf.mxu1 }
 0x1b4   : > { %v627_v29 = vadd.f32 %v1097_v27, %v1035_v25 }
 0x1b5   : > { %v1099_v30 = vpop.f32.mrf.mxu1 }
 0x1b6   : > { %v645_v31 = vmax.f32 %v627_v29, 0.0  ;;  %v1100_v32 = vadd.f32 %v1099_v30, %v1098_v28 }
 0x1b7   : > { %v1101_v33 = vpop.f32.mrf.mxu1 }
 0x1b8   : > { %v632_v34 = vadd.f32 %v1100_v32, %v1035_v25  ;;  %1217 = vmatprep.mubr.f32.mxu0 %v645_v31 }
 0x1b9   : > { %v1102_v35 = vpop.f32.mrf.mxu1 }
 0x1ba   : > { %v646_v36 = vmax.f32 %v632_v34, 0.0  ;;  %v1103_v37 = vadd.f32 %v1102_v35, %v1101_v33 }
 0x1bb   : > { %v1104_v38 = vpop.f32.mrf.mxu1 }
 0x1bc   : > { %v637_v39 = vadd.f32 %v1103_v37, %v1035_v25  ;;  %1218 = vmatmul.mubr.f32.vlgmr.msra.gmra.mxu0 %v646_v36 }
 0x1bd   : > { %v1105_v40 = vpop.f32.mrf.mxu1 }
 0x1be   : > { %v647_v41 = vmax.f32 %v637_v39, 0.0  ;;  %v1106_v42 = vadd.f32 %v1105_v40, %v1104_v38 }
 0x1c0   : > { %v642_v43 = vadd.f32 %v1106_v42, %v1035_v25  ;;  %1220 = vmatprep.mubr.f32.mxu0 %v647_v41 }
 0x1c2   : > { %v648_v44 = vmax.f32 %v642_v43, 0.0 }
 0x1c4   : > { %1221 = vmatmul.mubr.f32.gmra.mxu0 %v648_v44 }
 0x27c   : > { %v1219_v50 = vpop.f32.mrf.mxu0 }
 0x27d   : > { %v744_v51 = vadd.f32 %v1219_v50, %v1036_v49 }
 0x27e   : > { %v738_v53 = vpop.f32.mrf.mxu0 }
 0x27f   : > { %v739_v54 = vadd.f32 %v1036_v49, %v738_v53  ;;  %v758_v56 = vmax.f32 %v744_v51, 0.0  ;;  %v1039_v53 = vld [vmem:[%s1664_s9] ss:$0 sm:$0xff] }
 0x281   : > { %v757_v55 = vmax.f32 %v739_v54, 0.0 }
 0x283   : > { %1255 = vmatprep.mubr.f32.mxu1 %v757_v55  ;;  %v1040_v55 = vld [vmem:[%s1665_s10] ss:$0 sm:$0xff] }
 0x284   : > { %v1222_v57 = vpop.f32.mrf.mxu0  ;;  %1256 = vmatmul.mubr.f32.vlgmr.msra.gmra.mxu1 %v758_v56 }
 0x285   : > { %v754_v58 = vadd.f32 %v1222_v57, %v1036_v49 }
 0x286   : > { %v748_v59 = vpop.f32.mrf.mxu0 }
 0x287   : > { %v749_v60 = vadd.f32 %v1036_v49, %v748_v59  ;;  %v760_v62 = vmax.f32 %v754_v58, 0.0 }
 0x289   : > { %v759_v61 = vmax.f32 %v749_v60, 0.0 }
 0x28b   : > { %1258 = vmatprep.mubr.f32.mxu1 %v759_v61 }
 0x28c   : > { %1259 = vmatmul.mubr.f32.gmra.mxu1 %v760_v62 }
 0x344   : > { %v1257_v3 = vpop.f32.mrf.mxu1 }
 0x345   : > { %v856_v10 = vadd.f32 %v1257_v3, %v1037_v5 }
 0x346   : > { %v850_v6 = vpop.f32.mrf.mxu1 }
 0x347   : > { %v851_v7 = vadd.f32 %v1037_v5, %v850_v6  ;;  %v877_v13 = vmul.f32 %v1038_v9, %v856_v10 }
 0x349   : > { %v876_v11 = vmul.f32 %v1038_v9, %v851_v7 }
 0x34b   : > { %880 = vadd.xlane.f32.xlu0 %v876_v11 }
 0x34c   : > { %v1260_v12 = vpop.f32.mrf.mxu1 }
 0x34d   : > { %v866_v16 = vadd.f32 %v1260_v12, %v1037_v5 }
 0x34e   : > { %v860_v14 = vpop.f32.mrf.mxu1 }
 0x34f   : > { %v861_v15 = vadd.f32 %v1037_v5, %v860_v14  ;;  %882 = vadd.xlane.f32.xlu0 %v877_v13  ;;  %v879_v18 = vmul.f32 %v1038_v9, %v866_v16 }
 0x351   : > { %v878_v17 = vmul.f32 %v1038_v9, %v861_v15 }
 0x353   : > { %884 = vadd.xlane.f32.xlu1 %v878_v17 }
 0x357   : > { %886 = vadd.xlane.f32.xlu1 %v879_v18 }
 0x3d4   : > { %v881_v19 = vpop.xlane.xlu0 %880 }
 0x3d5   : > { %v888_v20 = vmul.f32 0.03125, %v881_v19 }
 0x3d7   : > { %v892_v21 = vsub.f32 %v851_v7, %v888_v20 }
 0x3d8   : > { %v883_v22 = vpop.xlane.xlu0 %882 }
 0x3d9   : > { %v889_v23 = vmul.f32 0.03125, %v883_v22  ;;  %v896_v24 = vmul.f32 %v1038_v9, %v892_v21 }
 0x3db   : > { %v893_v25 = vsub.f32 %v856_v10, %v889_v23  ;;  %v900_v26 = vmul.f32 %v896_v24, %v896_v24 }
 0x3dc   : > { %v885_v27 = vpop.xlane.xlu1 %884 }
 0x3dd   : > { %v890_v28 = vmul.f32 0.03125, %v885_v27  ;;  %904 = vadd.xlane.f32.xlu0 %v900_v26  ;;  %v897_v29 = vmul.f32 %v1038_v9, %v893_v25 }
 0x3df   : > { %v894_v30 = vsub.f32 %v861_v15, %v890_v28  ;;  %v901_v31 = vmul.f32 %v897_v29, %v897_v29 }
 0x3e0   : > { %v887_v32 = vpop.xlane.xlu1 %886 }
 0x3e1   : > { %v891_v33 = vmul.f32 0.03125, %v887_v32  ;;  %906 = vadd.xlane.f32.xlu1 %v901_v31  ;;  %v898_v34 = vmul.f32 %v1038_v9, %v894_v30 }
 0x3e3   : > { %v895_v35 = vsub.f32 %v866_v16, %v891_v33  ;;  %v902_v36 = vmul.f32 %v898_v34, %v898_v34 }
 0x3e5   : > { %908 = vadd.xlane.f32.xlu0 %v902_v36  ;;  %v899_v37 = vmul.f32 %v1038_v9, %v895_v35 }
 0x3e7   : > { %v903_v38 = vmul.f32 %v899_v37, %v899_v37 }
 0x3e9   : > { %910 = vadd.xlane.f32.xlu1 %v903_v38 }
 0x466   : > { %v905_v39 = vpop.xlane.xlu0 %904 }
 0x467   : > { %v912_v40 = vmul.f32 0.03125, %v905_v39 }
 0x469   : > { %v916_v41 = vadd.f32 1e-05, %v912_v40 }
 0x46a   : > { %v907_v42 = vpop.xlane.xlu1 %906 }
 0x46b   : > { %1270 = vrsqrt.f32 %v916_v41  ;;  %v913_v43 = vmul.f32 0.03125, %v907_v42 }
 0x46d   : > { %v917_v44 = vadd.f32 1e-05, %v913_v43 }
 0x46e   : > { %v909_v45 = vpop.xlane.xlu0 %908 }
 0x46f   : > { %1272 = vrsqrt.f32 %v917_v44  ;;  %v914_v46 = vmul.f32 0.03125, %v909_v45 }
 0x471   : > { %v918_v47 = vadd.f32 1e-05, %v914_v46 }
 0x472   : > { %v911_v48 = vpop.xlane.xlu1 %910 }
 0x473   : > { %1274 = vrsqrt.f32 %v918_v47  ;;  %v915_v49 = vmul.f32 0.03125, %v911_v48 }
 0x475   : > { %v919_v50 = vadd.f32 1e-05, %v915_v49 }
 0x477   : > { %1276 = vrsqrt.f32 %v919_v50 }
 0x478   : > { %v1271_v51 = vpop.eup %1270 }
 0x479   : > { %v924_v54 = vmul.f32 %v1271_v51, %v896_v24 }
 0x47b   : > { %v934_v56 = vmul.f32 %v1039_v53, %v924_v54 }
 0x47c   : > { %v1273_v57 = vpop.eup %1272 }
 0x47d   : > { %v944_v58 = vadd.f32 %v1040_v55, %v934_v56  ;;  %v925_v59 = vmul.f32 %v1273_v57, %v897_v29 }
 0x47f   : > { %v948_v60 = vadd.f32 %v944_v58, %v1518_v52  ;;  %v935_v61 = vmul.f32 %v1039_v53, %v925_v59 }
 0x480   : > { %v1275_v62 = vpop.eup %1274 }
 0x481   : > { %952 = vst [vmem:[%s410_s22] sm:$0xff] %v948_v60  ;;  %v945_v63 = vadd.f32 %v1040_v55, %v935_v61  ;;  %v926_v1 = vmul.f32 %v1275_v62, %v898_v34 }
 0x483   : > { %v949_v3 = vadd.f32 %v945_v63, %v1552_v0  ;;  %v936_v5 = vmul.f32 %v1039_v53, %v926_v1 }
 0x484   : > { %v1277_v6 = vpop.eup %1276 }
 0x485   : > { %953 = vst [vmem:[%s410_s22 + $0x8] sm:$0xff] %v949_v3  ;;  %v946_v7 = vadd.f32 %v1040_v55, %v936_v5  ;;  %v927_v8 = vmul.f32 %v1277_v6, %v899_v37 }
 0x487   : > { %v950_v9 = vadd.f32 %v946_v7, %v1556_v2  ;;  %v937_v10 = vmul.f32 %v1039_v53, %v927_v8 }
 0x489   : > { %954 = vst [vmem:[%s410_s22 + $0x10] sm:$0xff] %v950_v9  ;;  %v947_v11 = vadd.f32 %v1040_v55, %v937_v10 }
 0x48b   : > { %v951_v12 = vadd.f32 %v947_v11, %v1560_v4 }
 0x48d   : > { %955 = vst [vmem:[%s410_s22 + $0x18] sm:$0xff] %v951_v12 }
 0x48e PF: > { %s21_s17 = sadd.s32 1, %s1284_s17  }
 0x48f   : > { %p18_p4 = scmp.ge.s32.totalorder %s21_s17, 4  }
 0x491   :  { %20 = sbr.rel (!%p18_p4) target bundleno = 1 (0x1), region = 97 }

// kernel: _lambda_.2
= control target key start
LH: loop header
LB: loop body
LE: loop exit
PB: predicated region body
PF: predicated region fallthrough
CT: control target
= control target key end

     0   :  { %18 = vsyncpa [#allocation4], 0  ;;  %s3034_s0 = inlined_call_operand.hbm [shape: f32[64,128], index: 0, kind: input, shape index: {}]   ;;  %s3035_s1 = inlined_call_operand.vmem [shape: f32[64,128], index: 1, kind: input, shape index: {}]   ;;  %s3036_s2 = inlined_call_operand.vmem [shape: f32[128,128], index: 2, kind: input, shape index: {}]   ;;  %s3037_s3 = inlined_call_operand.vmem [shape: f32[256,128], index: 3, kind: input, shape index: {}]   ;;  %s3038_s4 = inlined_call_operand.vmem [shape: f32[1,128], index: 4, kind: input, shape index: {}]   ;;  %s3039_s5 = inlined_call_operand.vmem [shape: f32[128,128], index: 5, kind: input, shape index: {}]   ;;  %s3040_s6 = inlined_call_operand.vmem [shape: f32[1,128], index: 6, kind: input, shape index: {}]   ;;  %s3041_s7 = inlined_call_operand.vmem [shape: f32[128,128], index: 7, kind: input, shape index: {}]   ;;  %s3042_s8 = inlined_call_operand.vmem [shape: f32[1,128], index: 8, kind: input, shape index: {}]   ;;  %s3043_s9 = inlined_call_operand.vmem [shape: f32[1,128], index: 9, kind: input, shape index: {}]   ;;  %s3044_s10 = inlined_call_operand.vmem [shape: f32[1,128], index: 10, kind: input, shape index: {}]   ;;  %s3045_s11 = inlined_call_operand.vmem [shape: f32[128,128], index: 11, kind: output, shape index: {0}]   ;;  %s3046_s12 = inlined_call_operand.vmem [shape: f32[128,128], index: 12, kind: output, shape index: {1}]  }
   0x1   :  { %20 = vsyncpa [#allocation4 + $0x1], 0  ;;  %s2271_s21 = smov 0   ;;  %s2273_s22 = smov 0  }
   0x2   :  { %s2275_s23 = smov 0   ;;  %s2277_s24 = smov 0  }
   0x3 LB: > { %3049 = sst [smem:[#allocation6_spill]] %s2195_s23  ;;  %s2290_s25 = sadd.s32 4294967295, %s2199_s24   ;;  %s2199_s24 = sphi %s2277_s24, %s3060_s24   ;;  %s2195_s23 = sphi %s2275_s23, %s3059_s23   ;;  %s2191_s22 = sphi %s2273_s22, %s3058_s22   ;;  %s2187_s21 = sphi %s2271_s21, %s3057_s21  }
   0x4   : > { %s2293_s26 = sadd.s32 1, %s2199_s24   ;;  %s33_s28 = sadd.s32 1, %s2195_s23 }
   0x5   : > { %s30_s27 = ssub.s32 %s2199_s24, %s2293_s26  ;;  %p40_p1 = scmp.ne.s32.totalorder %s2195_s23, %s2191_s22 }
   0x6   : > { %p31_p0 = scmp.eq.s32.totalorder %s30_s27, 0  ;;  %p41_p2 = scmp.eq.s32.totalorder %s2199_s24, 0 }
   0x7   : > { %p46_p3 = scmp.ne.s32.totalorder %s2191_s22, %s2187_s21  ;;  %p47_p5 = scmp.eq.s32.totalorder %s2290_s25, 0 }
   0x8   : > { %s2303_s29 = scalar_select %p31_p0, %s2195_s23, %s33_s28  }
   0x9   : > { %p42_p4 = por %p41_p2, %p40_p1  ;;  %p2053_p6 = scmp.lt.s32.totalorder %s2199_s24, 2 }
   0xa   : > { %3050 = sst [smem:[#allocation7_spill]] %s2303_s29  ;;  %p2307_p7 = por %p47_p5, %p46_p3 }
   0xb   : > { %s354_s13 = sand.u32 1, %s2195_s23   ;;  %s1730_s15 = sshll.u32 %s2199_s24, 9 }
   0xc   : > { %s3051_s30 = scalar_select %p2307_p7, 1, 0 }
   0xd   : > { %s1697_s14 = sshll.u32 %s354_s13, 5  ;;  %s2316_s18 = scalar_lea.hbm %s3034_s0, %s1730_s15 }
   0xe   : > { %s358_s19 = scalar_lea.vmem [#allocation3], %s1697_s14  ;;  %p2320_p8 = pnand %p2053_p6, %p42_p4 }
   0xf   : > { %s365_s20 = sshll.u32 %s358_s19, 4  ;;  %s2325_s27 = scalar_lea.sflag [#allocation4], %s354_s13  ;;  %s2318_s20 = int_to_ptr.vmem [resolvable:$true] %s365_s20 }
  0x10   : > { %s2137_s28 = scalar_lea.hbm %s2316_s18, 512  ;;  %p2139_p11 = pneg %p2320_p8 }
  0x11   : > { %p2138_p10 = scmp.ne.s32.totalorder %s2316_s18, %s2137_s28  ;;  %s2142_s14 = scalar_lea.hbm %s3034_s0, 1024 }
  0x12   : > { %p2143_p0 = scmp.lt.s32.totalorder %s2316_s18, %s3034_s0  ;;  %p2144_p1 = scmp.lt.s32.totalorder %s2142_s14, %s2137_s28 }
  0x13   : > { %p2140_p12 = pnand %p2139_p11, %p2138_p10 }
  0x14   : > { %p2145_p2 = por %p2144_p1, %p2143_p0 }
  0x15   : > { %p2141_p13 = pneg %p2140_p12 }
  0x17   : > { %p2146_p3 = pnand %p2145_p2, %p2141_p13 }
  0x19   : > { %2149 = shalt.err (!%p2146_p3)
}
  0x1a   : > { %s2150_s13 = scalar_lea.vmem %s2318_s20, 512  ;;  %s2201_s29 = smov [#allocation3]  }
  0x1b   : > { %p2151_p4 = scmp.ne.s32.totalorder %s2318_s20, %s2150_s13  ;;  %s2155_s23 = sshll.u32 %s2201_s29, 4  ;;  %s2156_s23 = int_to_ptr.vmem [resolvable:$false] %s2155_s23 }
  0x1c   : > { %s2157_s15 = scalar_lea.vmem %s2156_s23, 1024  ;;  %p2158_p10 = scmp.lt.s32.totalorder %s2318_s20, %s2156_s23 }
  0x1d   : > { %p2153_p5 = pnand %p2151_p4, %p2139_p11  ;;  %p2159_p12 = scmp.lt.s32.totalorder %s2157_s15, %s2150_s13 }
  0x1f   : > { %p2154_p6 = pneg %p2153_p5  ;;  %p2160_p9 = por %p2159_p12, %p2158_p10 }
  0x21   : > { %p2161_p7 = pnand %p2160_p9, %p2154_p6 }
  0x23   : > { %2164 = shalt.err (!%p2161_p7)
}
  0x24   : > { %s2202_s28 = smov 128   ;;  %s2203_s16 = smov 8  }
  0x25   : > { %2052 = dma.hbm_to_vmem [thread:$0]  (!%p2320_p8), %s2316_s18, 512, %s2318_s20, %s2325_s27, %s2202_s28, %s2202_s28, %s2203_s16  }
  0x26   : > { %p382_p11 = scmp.lt.s32.totalorder %s2199_s24, 3  ;;  %p3053_p13 = scmp.ge.s32.totalorder %s2199_s24, 1 }
  0x28   : > { %p383_p0 = pnand %p3053_p13, %p382_p11 }
  0x29   : > { %s388_s23 = sand.u32 (!%p383_p0), 1, %s2191_s22   ;;  %p3054_p7 = scmp.ne.s32.totalorder (!%p383_p0), %s3051_s30, 0 }
  0x2a   : > { %386 = sbr.rel (%p383_p0) target bundleno = 1452 (0x5ac), region = 64  ;;  %s1701_s29 = sshll.u32 (!%p383_p0), %s388_s23, 5 }
  0x2b   : > { %s389_s14 = scalar_lea.sflag (!%p383_p0), [#allocation4], %s388_s23  ;;  %s2350_s17 = scalar_lea.vmem (!%p383_p0), [#allocation3], %s1701_s29 }
  0x2f   : > { %2182 = dma.done.wait (%p3054_p7), %s389_s14, 512  }
  0x30   : > { %2184 = vsyncadd (%p3054_p7), %s389_s14, 4294966784  ;;  %s1702_s19 = sshll.u32 %s2290_s25, 2  ;;  %p1704_p8 = scmp.ne.s32.totalorder %s2290_s25, 0 }
  0x31   : > { %p435_p9 = scmp.lt.s32.totalorder %s1702_s19, 7 }
  0x32   : > { %443 = sbr.rel (%p1704_p8) target bundleno = 64 (0x40), region = 72 }
  0x33   : > { %s3062_s19 = smov (!%p435_p9, %s1702_s19), 7 }
  0x34   : > { %s1703_s18 = sshll.u32 %s3062_s19, 3 }
  0x35   : > { %s2360_s21 = scalar_lea.vmem %s3035_s1, %s1703_s18 }
  0x37   : > { %v2204_v0 = vmov 0.0  }
  0x38   : > { %444 = vst [vmem:[#allocation2 + $0x30] sm:$0xff] %v2204_v0  ;;  %445 = vst [vmem:[#allocation2] sm:$0xff] %v2204_v0 }
  0x39   : > { %446 = vst [vmem:[#allocation2 + $0x58] sm:$0xff] %v2204_v0  ;;  %447 = vst [vmem:[#allocation2 + $0x18] sm:$0xff] %v2204_v0 }
  0x3a   : > { %448 = vst [vmem:[#allocation2 + $0x50] sm:$0xff] %v2204_v0  ;;  %449 = vst [vmem:[#allocation2 + $0x68] sm:$0xff] %v2204_v0 }
  0x3b   : > { %450 = vst [vmem:[#allocation2 + $0x8] sm:$0xff] %v2204_v0  ;;  %451 = vst [vmem:[#allocation2 + $0x48] sm:$0xff] %v2204_v0 }
  0x3c   : > { %452 = vst [vmem:[#allocation2 + $0x40] sm:$0xff] %v2204_v0  ;;  %453 = vst [vmem:[#allocation2 + $0x20] sm:$0xff] %v2204_v0 }
  0x3d   : > { %454 = vst [vmem:[#allocation2 + $0x10] sm:$0xff] %v2204_v0  ;;  %455 = vst [vmem:[#allocation2 + $0x38] sm:$0xff] %v2204_v0 }
  0x3e   : > { %456 = vst [vmem:[#allocation2 + $0x60] sm:$0xff] %v2204_v0  ;;  %457 = vst [vmem:[#allocation2 + $0x70] sm:$0xff] %v2204_v0 }
  0x3f   : > { %458 = vst [vmem:[#allocation2 + $0x78] sm:$0xff] %v2204_v0  ;;  %459 = vst [vmem:[#allocation2 + $0x28] sm:$0xff] %v2204_v0 }
  0x40 PF: > { %v476_v1 = vld [vmem:[%s2350_s17] sm:$0xff]  ;;  %v483_v2 = vld [vmem:[%s2360_s21 + $0x18] sm:$0xff]  ;;  %v482_v3 = vld [vmem:[%s2360_s21 + $0x10] sm:$0xff]  ;;  %vm516_vm0 = vcmask 261120   ;;  %p1721_p1 = scmp.ne.s32.totalorder %s2290_s25, 1 }
  0x41   : > { %484 = vxpose.xlu0.b32.start [1/4] (short) %v476_v1, 128  ;;  %v477_v4 = vld [vmem:[%s2350_s17 + $0x8] sm:$0xff]  ;;  %1895 = vmatprep.subr.mxu0 %v483_v2  ;;  %v480_v6 = vld [vmem:[%s2360_s21] sm:$0xff]  ;;  %v478_v7 = vld [vmem:[%s2350_s17 + $0x10] sm:$0xff] }
  0x42   : > { %2039 = vmatprep.subr.mxu1 %v483_v2  ;;  %1896 = vmatpush3.msra.mxu0 %v483_v2  ;;  %v481_v5 = vld [vmem:[%s2360_s21 + $0x8] sm:$0xff]  ;;  %v479_v8 = vld [vmem:[%s2350_s17 + $0x18] sm:$0xff]  ;;  %v461_v25 = vld [vmem:[#allocation2] sm:$0xff] }
  0x43   : > { %2043 = vmatpush3.msra.mxu1 %v483_v2  ;;  %1897 = vmatprep.subr.mxu0 %v482_v3  ;;  %v460_v27 = vld [vmem:[#allocation2 + $0x30] sm:$0xff]  ;;  %v463_v31 = vld [vmem:[#allocation2 + $0x18] sm:$0xff]  ;;  %v465_v37 = vld [vmem:[#allocation2 + $0x68] sm:$0xff] }
  0x44   : > { %2040 = vmatprep.subr.mxu1 %v482_v3  ;;  %1898 = vmatpush3.msra.mxu0 %v482_v3  ;;  %v462_v33 = vld [vmem:[#allocation2 + $0x58] sm:$0xff]  ;;  %v464_v39 = vld [vmem:[#allocation2 + $0x50] sm:$0xff]  ;;  %v467_v43 = vld [vmem:[#allocation2 + $0x48] sm:$0xff] }
  0x45   : > { %485 = vxpose.xlu0.b32.cont [2/4] (short) %v477_v4, 128  ;;  %1899 = vmatprep.subr.mxu0 %v481_v5  ;;  %v466_v45 = vld [vmem:[#allocation2 + $0x8] sm:$0xff]  ;;  %v469_v49 = vld [vmem:[#allocation2 + $0x20] sm:$0xff]  ;;  %v471_v55 = vld [vmem:[#allocation2 + $0x38] sm:$0xff] }
  0x46   : > { %2044 = vmatpush3.msra.mxu1 %v482_v3  ;;  %1900 = vmatpush3.msra.mxu0 %v481_v5  ;;  %v468_v51 = vld [vmem:[#allocation2 + $0x40] sm:$0xff]  ;;  %v470_v57 = vld [vmem:[#allocation2 + $0x10] sm:$0xff]  ;;  %v475_v3 = vld [vmem:[#allocation2 + $0x28] sm:$0xff] }
  0x47   : > { %2041 = vmatprep.subr.mxu1 %v481_v5  ;;  %1901 = vmatprep.subr.mxu0 %v480_v6  ;;  %v473_v61 = vld [vmem:[#allocation2 + $0x70] sm:$0xff]  ;;  %v472_v63 = vld [vmem:[#allocation2 + $0x60] sm:$0xff] }
  0x48   : > { %2045 = vmatpush3.msra.mxu1 %v481_v5  ;;  %1902 = vmatpush3.msra.mxu0 %v480_v6  ;;  %v474_v5 = vld [vmem:[#allocation2 + $0x78] sm:$0xff] }
  0x49   : > { %486 = vxpose.xlu0.b32.cont [3/4] (short) %v478_v7, 128  ;;  %2042 = vmatprep.subr.mxu1 %v480_v6 }
  0x4a   : > { %2046 = vmatpush3.msra.mxu1 %v480_v6 }
  0x4d   : > { %487 = vxpose.xlu0.b32.end [4/4] (short) %v479_v8, 128 }
  0xbd   : > { %v500_v9 = vpop.trf.xlu0 }
  0xbe   : > { %1903 = vmatprep.mubr.msk.f32.mxu0 %vm516_vm0, %v500_v9 }
  0xc1   : > { %v501_v10 = vpop.trf.xlu0 }
  0xc2   : > { %1904 = vmatmul.mubr.msk.f32.vlgmr.msra.gmra.mxu0 %vm516_vm0, %v501_v10 }
  0xc5   : > { %v502_v11 = vpop.trf.xlu0 }
  0xc6   : > { %1906 = vmatprep.mubr.msk.f32.mxu0 %vm516_vm0, %v502_v11 }
  0xc9   : > { %v503_v12 = vpop.trf.xlu0 }
  0xca   : > { %1907 = vmatmul.mubr.msk.f32.gmra.mxu0 %vm516_vm0, %v503_v12 }
  0xcd   : > { %v504_v13 = vpop.trf.xlu0 }
  0xce   : > { %1909 = vmatprep.mubr.msk.f32.mxu0 %vm516_vm0, %v504_v13 }
  0xd1   : > { %v505_v14 = vpop.trf.xlu0 }
  0xd2   : > { %1910 = vmatmul.mubr.msk.f32.gmra.mxu0 %vm516_vm0, %v505_v14 }
  0xd5   : > { %v506_v15 = vpop.trf.xlu0 }
  0xd6   : > { %1912 = vmatprep.mubr.msk.f32.mxu0 %vm516_vm0, %v506_v15 }
  0xd9   : > { %v507_v16 = vpop.trf.xlu0 }
  0xda   : > { %1913 = vmatmul.mubr.msk.f32.gmra.mxu0 %vm516_vm0, %v507_v16 }
  0xdd   : > { %v508_v17 = vpop.trf.xlu0 }
  0xde   : > { %1915 = vmatprep.mubr.msk.f32.mxu1 %vm516_vm0, %v508_v17 }
  0xe1   : > { %v509_v18 = vpop.trf.xlu0 }
  0xe2   : > { %1916 = vmatmul.mubr.msk.f32.vlgmr.msra.gmra.mxu1 %vm516_vm0, %v509_v18 }
  0xe5   : > { %v510_v19 = vpop.trf.xlu0 }
  0xe6   : > { %1918 = vmatprep.mubr.msk.f32.mxu1 %vm516_vm0, %v510_v19 }
  0xe9   : > { %v511_v20 = vpop.trf.xlu0 }
  0xea   : > { %1919 = vmatmul.mubr.msk.f32.gmra.mxu1 %vm516_vm0, %v511_v20 }
  0xed   : > { %v512_v21 = vpop.trf.xlu0 }
  0xee   : > { %1921 = vmatprep.mubr.msk.f32.mxu1 %vm516_vm0, %v512_v21 }
  0xf1   : > { %v513_v22 = vpop.trf.xlu0 }
  0xf2   : > { %1922 = vmatmul.mubr.msk.f32.gmra.mxu1 %vm516_vm0, %v513_v22 }
  0xf5   : > { %v514_v23 = vpop.trf.xlu0 }
  0xf6   : > { %1924 = vmatprep.mubr.msk.f32.mxu1 %vm516_vm0, %v514_v23 }
  0xf9   : > { %v515_v24 = vpop.trf.xlu0 }
  0xfa   : > { %1925 = vmatmul.mubr.msk.f32.gmra.mxu1 %vm516_vm0, %v515_v24 }
 0x182   : > { %v1905_v26 = vpop.f32.mrf.mxu0 }
 0x183   : > { %v711_v28 = vadd.f32 %v1905_v26, %v461_v25 }
 0x184   : > { %v631_v29 = vpop.f32.mrf.mxu0 }
 0x185   : > { %727 = vst [vmem:[#allocation2] sm:$0xff] %v711_v28  ;;  %v710_v30 = vadd.f32 %v631_v29, %v460_v27 }
 0x187   : > { %726 = vst [vmem:[#allocation2 + $0x30] sm:$0xff] %v710_v30 }
 0x18a   : > { %v1908_v32 = vpop.f32.mrf.mxu0 }
 0x18b   : > { %v713_v34 = vadd.f32 %v1908_v32, %v463_v31 }
 0x18c   : > { %v641_v35 = vpop.f32.mrf.mxu0 }
 0x18d   : > { %729 = vst [vmem:[#allocation2 + $0x18] sm:$0xff] %v713_v34  ;;  %v712_v36 = vadd.f32 %v641_v35, %v462_v33 }
 0x18f   : > { %728 = vst [vmem:[#allocation2 + $0x58] sm:$0xff] %v712_v36 }
 0x192   : > { %v1911_v38 = vpop.f32.mrf.mxu0 }
 0x193   : > { %v715_v40 = vadd.f32 %v1911_v38, %v465_v37 }
 0x194   : > { %v651_v41 = vpop.f32.mrf.mxu0 }
 0x195   : > { %731 = vst [vmem:[#allocation2 + $0x68] sm:$0xff] %v715_v40  ;;  %v714_v42 = vadd.f32 %v651_v41, %v464_v39 }
 0x197   : > { %730 = vst [vmem:[#allocation2 + $0x50] sm:$0xff] %v714_v42 }
 0x19a   : > { %v1914_v44 = vpop.f32.mrf.mxu0 }
 0x19b   : > { %v717_v46 = vadd.f32 %v1914_v44, %v467_v43 }
 0x19c   : > { %v661_v47 = vpop.f32.mrf.mxu0 }
 0x19d   : > { %733 = vst [vmem:[#allocation2 + $0x48] sm:$0xff] %v717_v46  ;;  %v716_v48 = vadd.f32 %v661_v47, %v466_v45 }
 0x19f   : > { %732 = vst [vmem:[#allocation2 + $0x8] sm:$0xff] %v716_v48 }
 0x1a2   : > { %v1917_v50 = vpop.f32.mrf.mxu1 }
 0x1a3   : > { %v719_v52 = vadd.f32 %v1917_v50, %v469_v49 }
 0x1a4   : > { %v671_v53 = vpop.f32.mrf.mxu1 }
 0x1a5   : > { %735 = vst [vmem:[#allocation2 + $0x20] sm:$0xff] %v719_v52  ;;  %v718_v54 = vadd.f32 %v671_v53, %v468_v51 }
 0x1a7   : > { %734 = vst [vmem:[#allocation2 + $0x40] sm:$0xff] %v718_v54 }
 0x1aa   : > { %v1920_v56 = vpop.f32.mrf.mxu1 }
 0x1ab   : > { %v721_v58 = vadd.f32 %v1920_v56, %v471_v55 }
 0x1ac   : > { %v681_v59 = vpop.f32.mrf.mxu1 }
 0x1ad   : > { %737 = vst [vmem:[#allocation2 + $0x38] sm:$0xff] %v721_v58  ;;  %v720_v60 = vadd.f32 %v681_v59, %v470_v57 }
 0x1af   : > { %736 = vst [vmem:[#allocation2 + $0x10] sm:$0xff] %v720_v60 }
 0x1b2   : > { %v1923_v62 = vpop.f32.mrf.mxu1 }
 0x1b3   : > { %v723_v0 = vadd.f32 %v1923_v62, %v473_v61 }
 0x1b4   : > { %v691_v1 = vpop.f32.mrf.mxu1 }
 0x1b5   : > { %739 = vst [vmem:[#allocation2 + $0x70] sm:$0xff] %v723_v0  ;;  %v722_v2 = vadd.f32 %v691_v1, %v472_v63 }
 0x1b7   : > { %738 = vst [vmem:[#allocation2 + $0x60] sm:$0xff] %v722_v2 }
 0x1ba   : > { %v1926_v4 = vpop.f32.mrf.mxu1 }
 0x1bb   : > { %v725_v6 = vadd.f32 %v1926_v4, %v475_v3  ;;  %745 = sbr.rel (%p1721_p1) target bundleno = 1452 (0x5ac), region = 76 }
 0x1bc   : > { %v701_v7 = vpop.f32.mrf.mxu1 }
 0x1bd   : > { %741 = vst [vmem:[#allocation2 + $0x28] sm:$0xff] %v725_v6  ;;  %v724_v8 = vadd.f32 %v701_v7, %v474_v5 }
 0x1bf   : > { %740 = vst [vmem:[#allocation2 + $0x78] sm:$0xff] %v724_v8 }
 0x1c0   : > { %v809_v9 = vld [vmem:[%s3037_s3 + $0xf8] sm:$0xff]  ;;  %v808_v11 = vld [vmem:[%s3037_s3 + $0xf0] sm:$0xff]  ;;  %v807_v13 = vld [vmem:[%s3037_s3 + $0xe8] sm:$0xff] }
 0x1c1   : > { %v793_v10 = vld [vmem:[%s3037_s3 + $0x78] sm:$0xff]  ;;  %1751 = vmatprep.subr.mxu0 %v809_v9  ;;  %v792_v12 = vld [vmem:[%s3037_s3 + $0x70] sm:$0xff]  ;;  %v791_v14 = vld [vmem:[%s3037_s3 + $0x68] sm:$0xff] }
 0x1c2   : > { %1752 = vmatpush3.msra.mxu0 %v793_v10  ;;  %v806_v15 = vld [vmem:[%s3037_s3 + $0xe0] sm:$0xff]  ;;  %v805_v17 = vld [vmem:[%s3037_s3 + $0xd8] sm:$0xff]  ;;  %v804_v19 = vld [vmem:[%s3037_s3 + $0xd0] sm:$0xff] }
 0x1c3   : > { %1753 = vmatprep.subr.mxu0 %v808_v11  ;;  %v790_v16 = vld [vmem:[%s3037_s3 + $0x60] sm:$0xff]  ;;  %v789_v18 = vld [vmem:[%s3037_s3 + $0x58] sm:$0xff]  ;;  %v788_v20 = vld [vmem:[%s3037_s3 + $0x50] sm:$0xff] }
 0x1c4   : > { %1754 = vmatpush3.msra.mxu0 %v792_v12  ;;  %v803_v21 = vld [vmem:[%s3037_s3 + $0xc8] sm:$0xff]  ;;  %v746_v22 = vld [vmem:[%s3036_s2] sm:$0xff]  ;;  %v801_v26 = vld [vmem:[%s3037_s3 + $0xb8] sm:$0xff] }
 0x1c5   : > { %1755 = vmatprep.subr.mxu0 %v807_v13  ;;  %v787_v23 = vld [vmem:[%s3037_s3 + $0x48] sm:$0xff]  ;;  %881 = vmatprep.mubr.f32.mxu0 %v746_v22  ;;  %v802_v24 = vld [vmem:[%s3037_s3 + $0xc0] sm:$0xff]  ;;  %v785_v27 = vld [vmem:[%s3037_s3 + $0x38] sm:$0xff] }
 0x1c6   : > { %1756 = vmatpush3.msra.mxu0 %v791_v14  ;;  %v786_v25 = vld [vmem:[%s3037_s3 + $0x40] sm:$0xff]  ;;  %v800_v28 = vld [vmem:[%s3037_s3 + $0xb0] sm:$0xff]  ;;  %v799_v30 = vld [vmem:[%s3037_s3 + $0xa8] sm:$0xff] }
 0x1c7   : > { %1757 = vmatprep.subr.mxu0 %v806_v15  ;;  %v784_v29 = vld [vmem:[%s3037_s3 + $0x30] sm:$0xff]  ;;  %v783_v31 = vld [vmem:[%s3037_s3 + $0x28] sm:$0xff]  ;;  %v798_v32 = vld [vmem:[%s3037_s3 + $0xa0] sm:$0xff] }
 0x1c8   : > { %1758 = vmatpush3.msra.mxu0 %v790_v16  ;;  %v782_v33 = vld [vmem:[%s3037_s3 + $0x20] sm:$0xff]  ;;  %v993_v34 = vld [vmem:[%s3039_s5 + $0x78] sm:$0xff]  ;;  %v992_v35 = vld [vmem:[%s3039_s5 + $0x70] sm:$0xff] }
 0x1c9   : > { %1759 = vmatprep.subr.mxu0 %v805_v17  ;;  %v797_v36 = vld [vmem:[%s3037_s3 + $0x98] sm:$0xff]  ;;  %1927 = vmatprep.subr.mxu1 %v993_v34  ;;  %v991_v38 = vld [vmem:[%s3039_s5 + $0x68] sm:$0xff]  ;;  %v796_v39 = vld [vmem:[%s3037_s3 + $0x90] sm:$0xff] }
 0x1ca   : > { %1760 = vmatpush3.msra.mxu0 %v789_v18  ;;  %v781_v37 = vld [vmem:[%s3037_s3 + $0x18] sm:$0xff]  ;;  %1928 = vmatpush3.msra.mxu1 %v993_v34  ;;  %v780_v40 = vld [vmem:[%s3037_s3 + $0x10] sm:$0xff]  ;;  %v990_v41 = vld [vmem:[%s3039_s5 + $0x60] sm:$0xff] }
 0x1cb   : > { %1761 = vmatprep.subr.mxu0 %v804_v19  ;;  %1929 = vmatprep.subr.mxu1 %v992_v35  ;;  %v795_v42 = vld [vmem:[%s3037_s3 + $0x88] sm:$0xff]  ;;  %v989_v44 = vld [vmem:[%s3039_s5 + $0x58] sm:$0xff]  ;;  %v794_v45 = vld [vmem:[%s3037_s3 + $0x80] sm:$0xff] }
 0x1cc   : > { %1762 = vmatpush3.msra.mxu0 %v788_v20  ;;  %1930 = vmatpush3.msra.mxu1 %v992_v35  ;;  %v779_v43 = vld [vmem:[%s3037_s3 + $0x8] sm:$0xff]  ;;  %v778_v46 = vld [vmem:[%s3037_s3] sm:$0xff]  ;;  %v988_v47 = vld [vmem:[%s3039_s5 + $0x50] sm:$0xff] }
 0x1cd   : > { %1763 = vmatprep.subr.mxu0 %v803_v21  ;;  %1931 = vmatprep.subr.mxu1 %v991_v38  ;;  %v762_v48 = vld [vmem:[#allocation2 + $0x30] sm:$0xff]  ;;  %v2508_v49 = vld [vmem:[%s3036_s2 + $0x8] sm:$0xff]  ;;  %v986_v51 = vld [vmem:[%s3039_s5 + $0x40] sm:$0xff] }
 0x1ce   : > { %1764 = vmatpush3.msra.mxu0 %v787_v23  ;;  %1932 = vmatpush3.msra.mxu1 %v991_v38  ;;  %v987_v50 = vld [vmem:[%s3039_s5 + $0x48] sm:$0xff]  ;;  %v763_v52 = vld [vmem:[#allocation2] sm:$0xff]  ;;  %v748_v53 = vld [vmem:[%s3036_s2 + $0x10] sm:$0xff] }
 0x1cf   : > { %1765 = vmatprep.subr.mxu0 %v802_v24  ;;  %1933 = vmatprep.subr.mxu1 %v990_v41  ;;  %v985_v54 = vld [vmem:[%s3039_s5 + $0x38] sm:$0xff]  ;;  %v984_v55 = vld [vmem:[%s3039_s5 + $0x30] sm:$0xff]  ;;  %v750_v59 = vld [vmem:[%s3036_s2 + $0x20] sm:$0xff] }
 0x1d0   : > { %1766 = vmatpush3.msra.mxu0 %v786_v25  ;;  %1934 = vmatpush3.msra.mxu1 %v990_v41  ;;  %v764_v56 = vld [vmem:[#allocation2 + $0x58] sm:$0xff]  ;;  %v766_v60 = vld [vmem:[#allocation2 + $0x50] sm:$0xff]  ;;  %v751_v61 = vld [vmem:[%s3036_s2 + $0x28] sm:$0xff] }
 0x1d1   : > { %1767 = vmatprep.subr.mxu0 %v801_v26  ;;  %1935 = vmatprep.subr.mxu1 %v989_v44  ;;  %v2529_v57 = vld [vmem:[%s3036_s2 + $0x18] sm:$0xff]  ;;  %v767_v62 = vld [vmem:[#allocation2 + $0x68] sm:$0xff]  ;;  %v752_v63 = vld [vmem:[%s3036_s2 + $0x30] sm:$0xff] }
 0x1d2   : > { %1768 = vmatpush3.msra.mxu0 %v785_v27  ;;  %1936 = vmatpush3.msra.mxu1 %v989_v44  ;;  %v765_v58 = vld [vmem:[#allocation2 + $0x18] sm:$0xff]  ;;  %v768_v0 = vld [vmem:[#allocation2 + $0x8] sm:$0xff]  ;;  %v754_v3 = vld [vmem:[%s3036_s2 + $0x40] sm:$0xff] }
 0x1d3   : > { %1769 = vmatprep.subr.mxu0 %v800_v28  ;;  %1937 = vmatprep.subr.mxu1 %v988_v47  ;;  %v753_v1 = vld [vmem:[%s3036_s2 + $0x38] sm:$0xff]  ;;  %v769_v2 = vld [vmem:[#allocation2 + $0x48] sm:$0xff]  ;;  %v770_v4 = vld [vmem:[#allocation2 + $0x40] sm:$0xff] }
 0x1d4   : > { %1770 = vmatpush3.msra.mxu0 %v784_v29  ;;  %1938 = vmatpush3.msra.mxu1 %v988_v47  ;;  %v755_v5 = vld [vmem:[%s3036_s2 + $0x48] sm:$0xff]  ;;  %v771_v6 = vld [vmem:[#allocation2 + $0x20] sm:$0xff]  ;;  %v756_v7 = vld [vmem:[%s3036_s2 + $0x50] sm:$0xff] }
 0x1d5   : > { %1771 = vmatprep.subr.mxu0 %v799_v30  ;;  %1939 = vmatprep.subr.mxu1 %v987_v50  ;;  %v772_v8 = vld [vmem:[#allocation2 + $0x10] sm:$0xff]  ;;  %v757_v9 = vld [vmem:[%s3036_s2 + $0x58] sm:$0xff]  ;;  %v758_v11 = vld [vmem:[%s3036_s2 + $0x60] sm:$0xff] }
 0x1d6   : > { %1772 = vmatpush3.msra.mxu0 %v783_v31  ;;  %1940 = vmatpush3.msra.mxu1 %v987_v50  ;;  %v773_v10 = vld [vmem:[#allocation2 + $0x38] sm:$0xff]  ;;  %v774_v12 = vld [vmem:[#allocation2 + $0x60] sm:$0xff]  ;;  %v759_v13 = vld [vmem:[%s3036_s2 + $0x68] sm:$0xff] }
 0x1d7   : > { %1773 = vmatprep.subr.mxu0 %v798_v32  ;;  %1941 = vmatprep.subr.mxu1 %v986_v51  ;;  %v775_v14 = vld [vmem:[#allocation2 + $0x70] sm:$0xff]  ;;  %v776_v16 = vld [vmem:[#allocation2 + $0x78] sm:$0xff]  ;;  %v777_v18 = vld [vmem:[#allocation2 + $0x28] sm:$0xff] }
 0x1d8   : > { %1774 = vmatpush3.msra.mxu0 %v782_v33  ;;  %1942 = vmatpush3.msra.mxu1 %v986_v51  ;;  %v760_v15 = vld [vmem:[%s3036_s2 + $0x70] sm:$0xff]  ;;  %v761_v17 = vld [vmem:[%s3036_s2 + $0x78] sm:$0xff]  ;;  %v983_v19 = vld [vmem:[%s3039_s5 + $0x28] sm:$0xff] }
 0x1d9   : > { %1775 = vmatprep.subr.mxu0 %v797_v36  ;;  %1943 = vmatprep.subr.mxu1 %v985_v54  ;;  %v982_v20 = vld [vmem:[%s3039_s5 + $0x20] sm:$0xff]  ;;  %v981_v21 = vld [vmem:[%s3039_s5 + $0x18] sm:$0xff]  ;;  %v980_v22 = vld [vmem:[%s3039_s5 + $0x10] sm:$0xff] }
 0x1da   : > { %1776 = vmatpush3.msra.mxu0 %v781_v37  ;;  %1944 = vmatpush3.msra.mxu1 %v985_v54  ;;  %v979_v23 = vld [vmem:[%s3039_s5 + $0x8] sm:$0xff]  ;;  %v978_v24 = vld [vmem:[%s3039_s5] sm:$0xff]  ;;  %v1177_v25 = vld [vmem:[%s3041_s7 + $0x78] sm:$0xff] }
 0x1db   : > { %1777 = vmatprep.subr.mxu0 %v796_v39  ;;  %1945 = vmatprep.subr.mxu1 %v984_v55  ;;  %v2592_v28 = vld [vmem:[%s3038_s4] ss:$0 sm:$0xff]  ;;  %v1176_v41 = vld [vmem:[%s3041_s7 + $0x70] sm:$0xff]  ;;  %v1175_v44 = vld [vmem:[%s3041_s7 + $0x68] sm:$0xff] }
 0x1dc   : > { %1778 = vmatpush3.msra.mxu0 %v780_v40  ;;  %1946 = vmatpush3.msra.mxu1 %v984_v55 }
 0x1dd   : > { %1779 = vmatprep.subr.mxu0 %v795_v42  ;;  %1947 = vmatprep.subr.mxu1 %v983_v19 }
 0x1de   : > { %1780 = vmatpush3.msra.mxu0 %v779_v43  ;;  %1948 = vmatpush3.msra.mxu1 %v983_v19 }
 0x1df   : > { %1781 = vmatprep.subr.mxu0 %v794_v45  ;;  %1949 = vmatprep.subr.mxu1 %v982_v20 }
 0x1e0   : > { %1782 = vmatpush3.msra.mxu0 %v778_v46  ;;  %1950 = vmatpush3.msra.mxu1 %v982_v20 }
 0x1e1   : > { %882 = vmatmul.mubr.f32.vlgmr.msra.gmra.mxu0 %v762_v48  ;;  %1951 = vmatprep.subr.mxu1 %v981_v21  ;;  %v1174_v48 = vld [vmem:[%s3041_s7 + $0x60] sm:$0xff] }
 0x1e2   : > { %886 = vmatprep.mubr.f32.mxu0 %v2508_v49  ;;  %1952 = vmatpush3.msra.mxu1 %v981_v21 }
 0x1e3   : > { %1953 = vmatprep.subr.mxu1 %v980_v22 }
 0x1e4   : > { %1954 = vmatpush3.msra.mxu1 %v980_v22 }
 0x1e5   : > { %887 = vmatmul.mubr.f32.gmra.mxu0 %v763_v52  ;;  %1955 = vmatprep.subr.mxu1 %v979_v23  ;;  %v1173_v52 = vld [vmem:[%s3041_s7 + $0x58] sm:$0xff] }
 0x1e6   : > { %891 = vmatprep.mubr.f32.mxu0 %v748_v53  ;;  %1956 = vmatpush3.msra.mxu1 %v979_v23 }
 0x1e7   : > { %1957 = vmatprep.subr.mxu1 %v978_v24 }
 0x1e8   : > { %1958 = vmatpush3.msra.mxu1 %v978_v24 }
 0x1e9   : > { %892 = vmatmul.mubr.f32.gmra.mxu0 %v764_v56  ;;  %1983 = vmatprep.subr.mxu1 %v1177_v25  ;;  %v1172_v56 = vld [vmem:[%s3041_s7 + $0x50] sm:$0xff] }
 0x1ea   : > { %896 = vmatprep.mubr.f32.mxu0 %v2529_v57 }
 0x1ed   : > { %897 = vmatmul.mubr.f32.gmra.mxu0 %v765_v58 }
 0x1ee   : > { %901 = vmatprep.mubr.f32.mxu0 %v750_v59 }
 0x1f1   : > { %902 = vmatmul.mubr.f32.gmra.mxu0 %v766_v60  ;;  %v1171_v60 = vld [vmem:[%s3041_s7 + $0x48] sm:$0xff] }
 0x1f2   : > { %906 = vmatprep.mubr.f32.mxu0 %v751_v61 }
 0x1f5   : > { %907 = vmatmul.mubr.f32.gmra.mxu0 %v767_v62 }
 0x1f6   : > { %911 = vmatprep.mubr.f32.mxu0 %v752_v63 }
 0x1f9   : > { %912 = vmatmul.mubr.f32.gmra.mxu0 %v768_v0  ;;  %v1170_v0 = vld [vmem:[%s3041_s7 + $0x40] sm:$0xff] }
 0x1fa   : > { %916 = vmatprep.mubr.f32.mxu0 %v753_v1 }
 0x1fd   : > { %917 = vmatmul.mubr.f32.gmra.mxu0 %v769_v2 }
 0x1fe   : > { %921 = vmatprep.mubr.f32.mxu0 %v754_v3  ;;  %v1169_v3 = vld [vmem:[%s3041_s7 + $0x38] sm:$0xff] }
 0x201   : > { %922 = vmatmul.mubr.f32.gmra.mxu0 %v770_v4 }
 0x202   : > { %926 = vmatprep.mubr.f32.mxu0 %v755_v5 }
 0x205   : > { %927 = vmatmul.mubr.f32.gmra.mxu0 %v771_v6 }
 0x206   : > { %931 = vmatprep.mubr.f32.mxu0 %v756_v7  ;;  %v1168_v7 = vld [vmem:[%s3041_s7 + $0x30] sm:$0xff] }
 0x209   : > { %932 = vmatmul.mubr.f32.gmra.mxu0 %v772_v8 }
 0x20a   : > { %936 = vmatprep.mubr.f32.mxu0 %v757_v9 }
 0x20d   : > { %937 = vmatmul.mubr.f32.gmra.mxu0 %v773_v10  ;;  %v1167_v10 = vld [vmem:[%s3041_s7 + $0x28] sm:$0xff] }
 0x20e   : > { %941 = vmatprep.mubr.f32.mxu0 %v758_v11 }
 0x211   : > { %942 = vmatmul.mubr.f32.gmra.mxu0 %v774_v12 }
 0x212   : > { %946 = vmatprep.mubr.f32.mxu0 %v759_v13 }
 0x215   : > { %947 = vmatmul.mubr.f32.gmra.mxu0 %v775_v14  ;;  %v1166_v14 = vld [vmem:[%s3041_s7 + $0x20] sm:$0xff] }
 0x216   : > { %951 = vmatprep.mubr.f32.mxu0 %v760_v15 }
 0x219   : > { %952 = vmatmul.mubr.f32.gmra.mxu0 %v776_v16 }
 0x21a   : > { %956 = vmatprep.mubr.f32.mxu0 %v761_v17 }
 0x21d   : > { %957 = vmatmul.mubr.f32.gmra.mxu0 %v777_v18 }
 0x2a1   : > { %v1783_v26 = vpop.f32.mrf.mxu0 }
 0x2a3   : > { %v1784_v27 = vpop.f32.mrf.mxu0 }
 0x2a4   : > { %v1785_v29 = vadd.f32 %v1784_v27, %v1783_v26 }
 0x2a5   : > { %v1786_v30 = vpop.f32.mrf.mxu0 }
 0x2a6   : > { %v884_v31 = vadd.f32 %v1785_v29, %v2592_v28 }
 0x2a7   : > { %v1787_v32 = vpop.f32.mrf.mxu0 }
 0x2a8   : > { %v1788_v33 = vadd.f32 %v1787_v32, %v1786_v30  ;;  %v962_v34 = vmax.f32 %v884_v31, 0.0 }
 0x2a9   : > { %v1789_v35 = vpop.f32.mrf.mxu0 }
 0x2aa   : > { %v889_v36 = vadd.f32 %v1788_v33, %v2592_v28  ;;  %1959 = vmatprep.mubr.f32.mxu1 %v962_v34 }
 0x2ab   : > { %v1790_v37 = vpop.f32.mrf.mxu0 }
 0x2ac   : > { %v963_v38 = vmax.f32 %v889_v36, 0.0  ;;  %v1791_v39 = vadd.f32 %v1790_v37, %v1789_v35 }
 0x2ad   : > { %v1792_v40 = vpop.f32.mrf.mxu0 }
 0x2ae   : > { %v894_v42 = vadd.f32 %v1791_v39, %v2592_v28  ;;  %1960 = vmatmul.mubr.f32.vlgmr.msra.gmra.mxu1 %v963_v38 }
 0x2af   : > { %v1793_v43 = vpop.f32.mrf.mxu0  ;;  %1984 = vmatpush3.msra.mxu1 %v1177_v25 }
 0x2b0   : > { %v964_v45 = vmax.f32 %v894_v42, 0.0  ;;  %v1794_v46 = vadd.f32 %v1793_v43, %v1792_v40  ;;  %1985 = vmatprep.subr.mxu1 %v1176_v41 }
 0x2b1   : > { %v1795_v47 = vpop.f32.mrf.mxu0  ;;  %1986 = vmatpush3.msra.mxu1 %v1176_v41 }
 0x2b2   : > { %v899_v50 = vadd.f32 %v1794_v46, %v2592_v28  ;;  %1962 = vmatprep.mubr.f32.mxu1 %v964_v45  ;;  %1987 = vmatprep.subr.mxu1 %v1175_v44 }
 0x2b3   : > { %v1796_v51 = vpop.f32.mrf.mxu0  ;;  %1988 = vmatpush3.msra.mxu1 %v1175_v44 }
 0x2b4   : > { %v965_v53 = vmax.f32 %v899_v50, 0.0  ;;  %v1797_v54 = vadd.f32 %v1796_v51, %v1795_v47  ;;  %1989 = vmatprep.subr.mxu1 %v1174_v48 }
 0x2b5   : > { %v1798_v55 = vpop.f32.mrf.mxu0  ;;  %1990 = vmatpush3.msra.mxu1 %v1174_v48 }
 0x2b6   : > { %v904_v58 = vadd.f32 %v1797_v54, %v2592_v28  ;;  %1963 = vmatmul.mubr.f32.gmra.mxu1 %v965_v53  ;;  %1991 = vmatprep.subr.mxu1 %v1173_v52 }
 0x2b7   : > { %v1799_v59 = vpop.f32.mrf.mxu0  ;;  %1992 = vmatpush3.msra.mxu1 %v1173_v52 }
 0x2b8   : > { %v966_v61 = vmax.f32 %v904_v58, 0.0  ;;  %v1800_v62 = vadd.f32 %v1799_v59, %v1798_v55  ;;  %1993 = vmatprep.subr.mxu1 %v1172_v56  ;;  %v1165_v59 = vld [vmem:[%s3041_s7 + $0x18] sm:$0xff] }
 0x2b9   : > { %v1801_v63 = vpop.f32.mrf.mxu0  ;;  %1994 = vmatpush3.msra.mxu1 %v1172_v56 }
 0x2ba   : > { %v909_v1 = vadd.f32 %v1800_v62, %v2592_v28  ;;  %1965 = vmatprep.mubr.f32.mxu1 %v966_v61  ;;  %1995 = vmatprep.subr.mxu1 %v1171_v60  ;;  %v1163_v61 = vld [vmem:[%s3041_s7 + $0x8] sm:$0xff]  ;;  %v1723_v62 = vld [vmem:[%s3040_s6] ss:$0 sm:$0xff] }
 0x2bb   : > { %v1802_v2 = vpop.f32.mrf.mxu0  ;;  %1996 = vmatpush3.msra.mxu1 %v1171_v60  ;;  %v1164_v60 = vld [vmem:[%s3041_s7 + $0x10] sm:$0xff] }
 0x2bc   : > { %v967_v4 = vmax.f32 %v909_v1, 0.0  ;;  %v1803_v5 = vadd.f32 %v1802_v2, %v1801_v63  ;;  %1997 = vmatprep.subr.mxu1 %v1170_v0 }
 0x2bd   : > { %v1804_v6 = vpop.f32.mrf.mxu0  ;;  %1998 = vmatpush3.msra.mxu1 %v1170_v0 }
 0x2be   : > { %v914_v8 = vadd.f32 %v1803_v5, %v2592_v28  ;;  %1966 = vmatmul.mubr.f32.gmra.mxu1 %v967_v4  ;;  %1999 = vmatprep.subr.mxu1 %v1169_v3 }
 0x2bf   : > { %v1805_v9 = vpop.f32.mrf.mxu0  ;;  %2000 = vmatpush3.msra.mxu1 %v1169_v3 }
 0x2c0   : > { %v968_v11 = vmax.f32 %v914_v8, 0.0  ;;  %v1806_v12 = vadd.f32 %v1805_v9, %v1804_v6  ;;  %2001 = vmatprep.subr.mxu1 %v1168_v7 }
 0x2c1   : > { %v1807_v13 = vpop.f32.mrf.mxu0  ;;  %2002 = vmatpush3.msra.mxu1 %v1168_v7 }
 0x2c2   : > { %v919_v15 = vadd.f32 %v1806_v12, %v2592_v28  ;;  %1968 = vmatprep.mubr.f32.mxu1 %v968_v11  ;;  %2003 = vmatprep.subr.mxu1 %v1167_v10 }
 0x2c3   : > { %v1808_v16 = vpop.f32.mrf.mxu0  ;;  %2004 = vmatpush3.msra.mxu1 %v1167_v10 }
 0x2c4   : > { %v969_v17 = vmax.f32 %v919_v15, 0.0  ;;  %v1809_v18 = vadd.f32 %v1808_v16, %v1807_v13  ;;  %2005 = vmatprep.subr.mxu1 %v1166_v14 }
 0x2c5   : > { %v1810_v19 = vpop.f32.mrf.mxu0  ;;  %2006 = vmatpush3.msra.mxu1 %v1166_v14 }
 0x2c6   : > { %v924_v20 = vadd.f32 %v1809_v18, %v2592_v28  ;;  %1969 = vmatmul.mubr.f32.gmra.mxu1 %v969_v17  ;;  %2007 = vmatprep.subr.mxu1 %v1165_v59 }
 0x2c7   : > { %v1811_v21 = vpop.f32.mrf.mxu0  ;;  %2008 = vmatpush3.msra.mxu1 %v1165_v59 }
 0x2c8   : > { %v970_v22 = vmax.f32 %v924_v20, 0.0  ;;  %v1812_v23 = vadd.f32 %v1811_v21, %v1810_v19  ;;  %2009 = vmatprep.subr.mxu1 %v1164_v60 }
 0x2c9   : > { %v1813_v24 = vpop.f32.mrf.mxu0  ;;  %2010 = vmatpush3.msra.mxu1 %v1164_v60 }
 0x2ca   : > { %v929_v25 = vadd.f32 %v1812_v23, %v2592_v28  ;;  %1971 = vmatprep.mubr.f32.mxu1 %v970_v22  ;;  %2011 = vmatprep.subr.mxu1 %v1163_v61 }
 0x2cb   : > { %v1814_v26 = vpop.f32.mrf.mxu0  ;;  %2012 = vmatpush3.msra.mxu1 %v1163_v61 }
 0x2cc   : > { %v971_v27 = vmax.f32 %v929_v25, 0.0  ;;  %v1815_v29 = vadd.f32 %v1814_v26, %v1813_v24 }
 0x2cd   : > { %v1816_v30 = vpop.f32.mrf.mxu0 }
 0x2ce   : > { %v934_v31 = vadd.f32 %v1815_v29, %v2592_v28  ;;  %1972 = vmatmul.mubr.f32.gmra.mxu1 %v971_v27 }
 0x2cf   : > { %v1817_v32 = vpop.f32.mrf.mxu0 }
 0x2d0   : > { %v972_v33 = vmax.f32 %v934_v31, 0.0  ;;  %v1818_v34 = vadd.f32 %v1817_v32, %v1816_v30 }
 0x2d1   : > { %v1819_v35 = vpop.f32.mrf.mxu0 }
 0x2d2   : > { %v939_v36 = vadd.f32 %v1818_v34, %v2592_v28  ;;  %1974 = vmatprep.mubr.f32.mxu1 %v972_v33 }
 0x2d3   : > { %v1820_v37 = vpop.f32.mrf.mxu0 }
 0x2d4   : > { %v973_v38 = vmax.f32 %v939_v36, 0.0  ;;  %v1821_v39 = vadd.f32 %v1820_v37, %v1819_v35 }
 0x2d5   : > { %v1822_v40 = vpop.f32.mrf.mxu0 }
 0x2d6   : > { %v944_v41 = vadd.f32 %v1821_v39, %v2592_v28  ;;  %1975 = vmatmul.mubr.f32.gmra.mxu1 %v973_v38 }
 0x2d7   : > { %v1823_v42 = vpop.f32.mrf.mxu0 }
 0x2d8   : > { %v974_v43 = vmax.f32 %v944_v41, 0.0  ;;  %v1824_v44 = vadd.f32 %v1823_v42, %v1822_v40 }
 0x2d9   : > { %v1825_v45 = vpop.f32.mrf.mxu0 }
 0x2da   : > { %v949_v46 = vadd.f32 %v1824_v44, %v2592_v28  ;;  %1977 = vmatprep.mubr.f32.mxu1 %v974_v43 }
 0x2db   : > { %v1826_v47 = vpop.f32.mrf.mxu0 }
 0x2dc   : > { %v975_v48 = vmax.f32 %v949_v46, 0.0  ;;  %v1827_v50 = vadd.f32 %v1826_v47, %v1825_v45 }
 0x2dd   : > { %v1828_v51 = vpop.f32.mrf.mxu0 }
 0x2de   : > { %v954_v52 = vadd.f32 %v1827_v50, %v2592_v28  ;;  %1978 = vmatmul.mubr.f32.gmra.mxu1 %v975_v48  ;;  %v1332_v48 = vlaneseq }
 0x2df   : > { %v1829_v53 = vpop.f32.mrf.mxu0 }
 0x2e0   : > { %v976_v54 = vmax.f32 %v954_v52, 0.0  ;;  %v1830_v55 = vadd.f32 %v1829_v53, %v1828_v51  ;;  %v1333_v50 = vand.u32 127, %v1332_v48  ;;  %v1724_v51 = vld [vmem:[%s3042_s8] ss:$0 sm:$0xff]  ;;  %v2205_v53 = vmov 0.0  }
 0x2e2   : > { %v959_v56 = vadd.f32 %v1830_v55, %v2592_v28  ;;  %1980 = vmatprep.mubr.f32.mxu1 %v976_v54  ;;  %v1162_v28 = vld [vmem:[%s3041_s7] sm:$0xff]  ;;  %vm1334_vm1 = vcmp.lt.s32.totalorder %v1333_v50, 32 }
 0x2e3   : > { %2013 = vmatprep.subr.mxu1 %v1162_v28  ;;  %v2661_v54 = vsel %vm1334_vm1, 1.0, %v2205_v53 }
 0x2e4   : > { %v977_v58 = vmax.f32 %v959_v56, 0.0  ;;  %2014 = vmatpush3.msra.mxu1 %v1162_v28 }
 0x2e6   : > { %1981 = vmatmul.mubr.f32.gmra.mxu1 %v977_v58 }
 0x36e   : > { %v1961_v63 = vpop.f32.mrf.mxu1 }
 0x36f   : > { %v1073_v0 = vadd.f32 %v1961_v63, %v1723_v62 }
 0x370   : > { %v1067_v1 = vpop.f32.mrf.mxu1 }
 0x371   : > { %v1068_v2 = vadd.f32 %v1723_v62, %v1067_v1  ;;  %v1147_v4 = vmax.f32 %v1073_v0, 0.0 }
 0x373   : > { %v1146_v3 = vmax.f32 %v1068_v2, 0.0 }
 0x375   : > { %2015 = vmatprep.mubr.f32.mxu1 %v1146_v3 }
 0x376   : > { %v1964_v5 = vpop.f32.mrf.mxu1  ;;  %2016 = vmatmul.mubr.f32.vlgmr.msra.gmra.mxu1 %v1147_v4 }
 0x377   : > { %v1083_v6 = vadd.f32 %v1964_v5, %v1723_v62 }
 0x378   : > { %v1077_v7 = vpop.f32.mrf.mxu1 }
 0x379   : > { %v1078_v8 = vadd.f32 %v1723_v62, %v1077_v7  ;;  %v1149_v10 = vmax.f32 %v1083_v6, 0.0 }
 0x37b   : > { %v1148_v9 = vmax.f32 %v1078_v8, 0.0 }
 0x37d   : > { %2018 = vmatprep.mubr.f32.mxu1 %v1148_v9 }
 0x37e   : > { %v1967_v11 = vpop.f32.mrf.mxu1  ;;  %2019 = vmatmul.mubr.f32.gmra.mxu1 %v1149_v10 }
 0x37f   : > { %v1093_v12 = vadd.f32 %v1967_v11, %v1723_v62 }
 0x380   : > { %v1087_v13 = vpop.f32.mrf.mxu1 }
 0x381   : > { %v1088_v14 = vadd.f32 %v1723_v62, %v1087_v13  ;;  %v1151_v16 = vmax.f32 %v1093_v12, 0.0 }
 0x383   : > { %v1150_v15 = vmax.f32 %v1088_v14, 0.0 }
 0x385   : > { %2021 = vmatprep.mubr.f32.mxu1 %v1150_v15 }
 0x386   : > { %v1970_v17 = vpop.f32.mrf.mxu1  ;;  %2022 = vmatmul.mubr.f32.gmra.mxu1 %v1151_v16 }
 0x387   : > { %v1103_v18 = vadd.f32 %v1970_v17, %v1723_v62 }
 0x388   : > { %v1097_v19 = vpop.f32.mrf.mxu1 }
 0x389   : > { %v1098_v20 = vadd.f32 %v1723_v62, %v1097_v19  ;;  %v1153_v22 = vmax.f32 %v1103_v18, 0.0 }
 0x38b   : > { %v1152_v21 = vmax.f32 %v1098_v20, 0.0 }
 0x38d   : > { %2024 = vmatprep.mubr.f32.mxu1 %v1152_v21 }
 0x38e   : > { %v1973_v23 = vpop.f32.mrf.mxu1  ;;  %2025 = vmatmul.mubr.f32.gmra.mxu1 %v1153_v22 }
 0x38f   : > { %v1113_v24 = vadd.f32 %v1973_v23, %v1723_v62 }
 0x390   : > { %v1107_v25 = vpop.f32.mrf.mxu1 }
 0x391   : > { %v1108_v26 = vadd.f32 %v1723_v62, %v1107_v25  ;;  %v1155_v29 = vmax.f32 %v1113_v24, 0.0 }
 0x393   : > { %v1154_v27 = vmax.f32 %v1108_v26, 0.0 }
 0x395   : > { %2027 = vmatprep.mubr.f32.mxu1 %v1154_v27 }
 0x396   : > { %v1976_v30 = vpop.f32.mrf.mxu1  ;;  %2028 = vmatmul.mubr.f32.gmra.mxu1 %v1155_v29 }
 0x397   : > { %v1123_v31 = vadd.f32 %v1976_v30, %v1723_v62 }
 0x398   : > { %v1117_v32 = vpop.f32.mrf.mxu1 }
 0x399   : > { %v1118_v33 = vadd.f32 %v1723_v62, %v1117_v32  ;;  %v1157_v35 = vmax.f32 %v1123_v31, 0.0 }
 0x39b   : > { %v1156_v34 = vmax.f32 %v1118_v33, 0.0 }
 0x39d   : > { %2030 = vmatprep.mubr.f32.mxu1 %v1156_v34 }
 0x39e   : > { %v1979_v36 = vpop.f32.mrf.mxu1  ;;  %2031 = vmatmul.mubr.f32.gmra.mxu1 %v1157_v35 }
 0x39f   : > { %v1133_v37 = vadd.f32 %v1979_v36, %v1723_v62 }
 0x3a0   : > { %v1127_v38 = vpop.f32.mrf.mxu1 }
 0x3a1   : > { %v1128_v39 = vadd.f32 %v1723_v62, %v1127_v38  ;;  %v1159_v41 = vmax.f32 %v1133_v37, 0.0 }
 0x3a3   : > { %v1158_v40 = vmax.f32 %v1128_v39, 0.0 }
 0x3a5   : > { %2033 = vmatprep.mubr.f32.mxu1 %v1158_v40 }
 0x3a6   : > { %v1982_v42 = vpop.f32.mrf.mxu1  ;;  %2034 = vmatmul.mubr.f32.gmra.mxu1 %v1159_v41 }
 0x3a7   : > { %v1143_v43 = vadd.f32 %v1982_v42, %v1723_v62 }
 0x3a8   : > { %v1137_v44 = vpop.f32.mrf.mxu1 }
 0x3a9   : > { %v1138_v45 = vadd.f32 %v1723_v62, %v1137_v44  ;;  %v1161_v47 = vmax.f32 %v1143_v43, 0.0 }
 0x3ab   : > { %v1160_v46 = vmax.f32 %v1138_v45, 0.0 }
 0x3ad   : > { %2036 = vmatprep.mubr.f32.mxu1 %v1160_v46 }
 0x3ae   : > { %2037 = vmatmul.mubr.f32.gmra.mxu1 %v1161_v47 }
 0x436   : > { %v2017_v52 = vpop.f32.mrf.mxu1 }
 0x437   : > { %v2663_v55 = vadd.f32 %v2017_v52, %v1724_v51 }
 0x438   : > { %v1251_v56 = vpop.f32.mrf.mxu1 }
 0x439   : > { %v2665_v58 = vadd.f32 %v1724_v51, %v1251_v56  ;;  %v1338_v59 = vmul.f32 %v2661_v54, %v2663_v55 }
 0x43b   : > { %1355 = vadd.xlane.f32.xlu0 %v1338_v59  ;;  %v1337_v60 = vmul.f32 %v2661_v54, %v2665_v58 }
 0x43e   : > { %v2020_v61 = vpop.f32.mrf.mxu1 }
 0x43f   : > { %v2671_v28 = vadd.f32 %v2020_v61, %v1724_v51  ;;  %1353 = vadd.xlane.f32.xlu0 %v1337_v60 }
 0x440   : > { %v1261_v62 = vpop.f32.mrf.mxu1 }
 0x441   : > { %v2673_v63 = vadd.f32 %v1724_v51, %v1261_v62  ;;  %v1340_v0 = vmul.f32 %v2661_v54, %v2671_v28 }
 0x443   : > { %1359 = vadd.xlane.f32.xlu1 %v1340_v0  ;;  %v1339_v1 = vmul.f32 %v2661_v54, %v2673_v63 }
 0x446   : > { %v2023_v2 = vpop.f32.mrf.mxu1 }
 0x447   : > { %v2679_v3 = vadd.f32 %v2023_v2, %v1724_v51  ;;  %1357 = vadd.xlane.f32.xlu1 %v1339_v1 }
 0x448   : > { %v1271_v4 = vpop.f32.mrf.mxu1 }
 0x449   : > { %v2681_v5 = vadd.f32 %v1724_v51, %v1271_v4  ;;  %v1342_v6 = vmul.f32 %v2661_v54, %v2679_v3 }
 0x44b   : > { %1363 = vadd.xlane.f32.xlu1 %v1342_v6  ;;  %v1341_v7 = vmul.f32 %v2661_v54, %v2681_v5 }
 0x44d   : > { %1361 = vadd.xlane.f32.xlu0 %v1341_v7 }
 0x44e   : > { %v2026_v8 = vpop.f32.mrf.mxu1 }
 0x44f   : > { %v2687_v9 = vadd.f32 %v2026_v8, %v1724_v51 }
 0x450   : > { %v1281_v10 = vpop.f32.mrf.mxu1 }
 0x451   : > { %v2689_v11 = vadd.f32 %v1724_v51, %v1281_v10  ;;  %v1344_v12 = vmul.f32 %v2661_v54, %v2687_v9 }
 0x453   : > { %1367 = vadd.xlane.f32.xlu1 %v1344_v12  ;;  %v1343_v13 = vmul.f32 %v2661_v54, %v2689_v11 }
 0x455   : > { %1365 = vadd.xlane.f32.xlu0 %v1343_v13 }
 0x456   : > { %v2029_v14 = vpop.f32.mrf.mxu1 }
 0x457   : > { %v2695_v15 = vadd.f32 %v2029_v14, %v1724_v51 }
 0x458   : > { %v1291_v16 = vpop.f32.mrf.mxu1 }
 0x459   : > { %v2697_v17 = vadd.f32 %v1724_v51, %v1291_v16  ;;  %v1346_v18 = vmul.f32 %v2661_v54, %v2695_v15 }
 0x45b   : > { %1371 = vadd.xlane.f32.xlu1 %v1346_v18  ;;  %v1345_v19 = vmul.f32 %v2661_v54, %v2697_v17 }
 0x45d   : > { %1369 = vadd.xlane.f32.xlu0 %v1345_v19 }
 0x45e   : > { %v2032_v20 = vpop.f32.mrf.mxu1 }
 0x45f   : > { %v2703_v21 = vadd.f32 %v2032_v20, %v1724_v51 }
 0x460   : > { %v1301_v22 = vpop.f32.mrf.mxu1 }
 0x461   : > { %v2705_v23 = vadd.f32 %v1724_v51, %v1301_v22  ;;  %v1348_v24 = vmul.f32 %v2661_v54, %v2703_v21 }
 0x463   : > { %1375 = vadd.xlane.f32.xlu1 %v1348_v24  ;;  %v1347_v25 = vmul.f32 %v2661_v54, %v2705_v23 }
 0x465   : > { %1373 = vadd.xlane.f32.xlu0 %v1347_v25 }
 0x466   : > { %v2035_v26 = vpop.f32.mrf.mxu1 }
 0x467   : > { %v2711_v27 = vadd.f32 %v2035_v26, %v1724_v51 }
 0x468   : > { %v1311_v29 = vpop.f32.mrf.mxu1 }
 0x469   : > { %v2713_v30 = vadd.f32 %v1724_v51, %v1311_v29  ;;  %v1350_v31 = vmul.f32 %v2661_v54, %v2711_v27 }
 0x46b   : > { %1379 = vadd.xlane.f32.xlu1 %v1350_v31  ;;  %v1349_v32 = vmul.f32 %v2661_v54, %v2713_v30 }
 0x46d   : > { %1377 = vadd.xlane.f32.xlu0 %v1349_v32 }
 0x46e   : > { %v2038_v33 = vpop.f32.mrf.mxu1 }
 0x46f   : > { %v2719_v34 = vadd.f32 %v2038_v33, %v1724_v51 }
 0x470   : > { %v1321_v35 = vpop.f32.mrf.mxu1 }
 0x471   : > { %v2721_v36 = vadd.f32 %v1724_v51, %v1321_v35  ;;  %v1352_v37 = vmul.f32 %v2661_v54, %v2719_v34 }
 0x473   : > { %1383 = vadd.xlane.f32.xlu1 %v1352_v37  ;;  %v1351_v38 = vmul.f32 %v2661_v54, %v2721_v36 }
 0x475   : > { %1381 = vadd.xlane.f32.xlu0 %v1351_v38 }
 0x4c4   : > { %v1356_v39 = vpop.xlane.xlu0 %1355 }
 0x4c5   : > { %v1386_v40 = vmul.f32 0.03125, %v1356_v39 }
 0x4c7   : > { %v1402_v41 = vsub.f32 %v2663_v55, %v1386_v40 }
 0x4c8   : > { %v1354_v42 = vpop.xlane.xlu0 %1353 }
 0x4c9   : > { %v1385_v43 = vmul.f32 0.03125, %v1354_v42  ;;  %v2729_v44 = vmul.f32 %v2661_v54, %v1402_v41 }
 0x4cb   : > { %v1401_v45 = vsub.f32 %v2665_v58, %v1385_v43  ;;  %v1434_v46 = vmul.f32 %v2729_v44, %v2729_v44 }
 0x4cc   : > { %v1360_v47 = vpop.xlane.xlu1 %1359 }
 0x4cd   : > { %v1388_v48 = vmul.f32 0.03125, %v1360_v47  ;;  %1451 = vadd.xlane.f32.xlu1 %v1434_v46  ;;  %v2735_v50 = vmul.f32 %v2661_v54, %v1401_v45 }
 0x4cf   : > { %v1404_v51 = vsub.f32 %v2671_v28, %v1388_v48  ;;  %v1433_v52 = vmul.f32 %v2735_v50, %v2735_v50 }
 0x4d0   : > { %v1358_v53 = vpop.xlane.xlu1 %1357 }
 0x4d1   : > { %v1387_v55 = vmul.f32 0.03125, %v1358_v53  ;;  %1449 = vadd.xlane.f32.xlu0 %v1433_v52  ;;  %v2741_v56 = vmul.f32 %v2661_v54, %v1404_v51 }
 0x4d3   : > { %v1403_v58 = vsub.f32 %v2673_v63, %v1387_v55  ;;  %v1436_v59 = vmul.f32 %v2741_v56, %v2741_v56 }
 0x4d4   : > { %v1364_v60 = vpop.xlane.xlu1 %1363 }
 0x4d5   : > { %v1390_v61 = vmul.f32 0.03125, %v1364_v60  ;;  %1455 = vadd.xlane.f32.xlu1 %v1436_v59  ;;  %v2747_v62 = vmul.f32 %v2661_v54, %v1403_v58 }
 0x4d6   : > { %v1362_v28 = vpop.xlane.xlu0 %1361 }
 0x4d7   : > { %v1406_v0 = vsub.f32 %v2679_v3, %v1390_v61  ;;  %v1389_v1 = vmul.f32 0.03125, %v1362_v28  ;;  %v1435_v2 = vmul.f32 %v2747_v62, %v2747_v62 }
 0x4d9   : > { %v1405_v4 = vsub.f32 %v2681_v5, %v1389_v1  ;;  %1453 = vadd.xlane.f32.xlu0 %v1435_v2  ;;  %v2754_v63 = vmul.f32 %v2661_v54, %v1406_v0 }
 0x4db   : > { %v1438_v6 = vmul.f32 %v2754_v63, %v2754_v63  ;;  %v2759_v7 = vmul.f32 %v2661_v54, %v1405_v4 }
 0x4dc   : > { %v1368_v8 = vpop.xlane.xlu1 %1367 }
 0x4dd   : > { %v1392_v10 = vmul.f32 0.03125, %v1368_v8  ;;  %1459 = vadd.xlane.f32.xlu1 %v1438_v6  ;;  %v1437_v3 = vmul.f32 %v2759_v7, %v2759_v7 }
 0x4de   : > { %v1366_v12 = vpop.xlane.xlu0 %1365 }
 0x4df   : > { %v1408_v13 = vsub.f32 %v2687_v9, %v1392_v10  ;;  %v1391_v5 = vmul.f32 0.03125, %v1366_v12  ;;  %1457 = vadd.xlane.f32.xlu0 %v1437_v3 }
 0x4e1   : > { %v1407_v14 = vsub.f32 %v2689_v11, %v1391_v5  ;;  %v2766_v16 = vmul.f32 %v2661_v54, %v1408_v13 }
 0x4e3   : > { %v1440_v18 = vmul.f32 %v2766_v16, %v2766_v16  ;;  %v2771_v19 = vmul.f32 %v2661_v54, %v1407_v14 }
 0x4e4   : > { %v1372_v20 = vpop.xlane.xlu1 %1371 }
 0x4e5   : > { %v1394_v22 = vmul.f32 0.03125, %v1372_v20  ;;  %1463 = vadd.xlane.f32.xlu1 %v1440_v18  ;;  %v1439_v24 = vmul.f32 %v2771_v19, %v2771_v19 }
 0x4e6   : > { %v1370_v9 = vpop.xlane.xlu0 %1369 }
 0x4e7   : > { %v1410_v25 = vsub.f32 %v2695_v15, %v1394_v22  ;;  %v1393_v26 = vmul.f32 0.03125, %v1370_v9  ;;  %1461 = vadd.xlane.f32.xlu0 %v1439_v24  ;;  %v2826_v24 = vld [vmem:[%s3043_s9] ss:$0 sm:$0xff] }
 0x4e9   : > { %v1409_v11 = vsub.f32 %v2697_v17, %v1393_v26  ;;  %v2778_v29 = vmul.f32 %v2661_v54, %v1410_v25 }
 0x4eb   : > { %v1442_v31 = vmul.f32 %v2778_v29, %v2778_v29  ;;  %v2783_v32 = vmul.f32 %v2661_v54, %v1409_v11 }
 0x4ec   : > { %v1376_v33 = vpop.xlane.xlu1 %1375 }
 0x4ed   : > { %v1396_v35 = vmul.f32 0.03125, %v1376_v33  ;;  %1467 = vadd.xlane.f32.xlu1 %v1442_v31  ;;  %v1441_v37 = vmul.f32 %v2783_v32, %v2783_v32  ;;  %v2832_v31 = vld [vmem:[%s3044_s10] ss:$0 sm:$0xff] }
 0x4ee   : > { %v1374_v15 = vpop.xlane.xlu0 %1373 }
 0x4ef   : > { %v1412_v38 = vsub.f32 %v2703_v21, %v1396_v35  ;;  %v1395_v39 = vmul.f32 0.03125, %v1374_v15  ;;  %1465 = vadd.xlane.f32.xlu0 %v1441_v37 }
 0x4f1   : > { %v1411_v17 = vsub.f32 %v2705_v23, %v1395_v39  ;;  %v2790_v40 = vmul.f32 %v2661_v54, %v1412_v38 }
 0x4f3   : > { %v1444_v41 = vmul.f32 %v2790_v40, %v2790_v40  ;;  %v2795_v42 = vmul.f32 %v2661_v54, %v1411_v17 }
 0x4f4   : > { %v1380_v43 = vpop.xlane.xlu1 %1379 }
 0x4f5   : > { %v1398_v45 = vmul.f32 0.03125, %v1380_v43  ;;  %1471 = vadd.xlane.f32.xlu1 %v1444_v41  ;;  %v1443_v46 = vmul.f32 %v2795_v42, %v2795_v42 }
 0x4f6   : > { %v1378_v21 = vpop.xlane.xlu0 %1377 }
 0x4f7   : > { %v1414_v47 = vsub.f32 %v2711_v27, %v1398_v45  ;;  %v1397_v48 = vmul.f32 0.03125, %v1378_v21  ;;  %1469 = vadd.xlane.f32.xlu0 %v1443_v46 }
 0x4f9   : > { %v1413_v23 = vsub.f32 %v2713_v30, %v1397_v48  ;;  %v2802_v51 = vmul.f32 %v2661_v54, %v1414_v47 }
 0x4fb   : > { %v1446_v52 = vmul.f32 %v2802_v51, %v2802_v51  ;;  %v2807_v53 = vmul.f32 %v2661_v54, %v1413_v23 }
 0x4fc   : > { %v1384_v55 = vpop.xlane.xlu1 %1383 }
 0x4fd   : > { %v1400_v58 = vmul.f32 0.03125, %v1384_v55  ;;  %1475 = vadd.xlane.f32.xlu1 %v1446_v52  ;;  %v1445_v59 = vmul.f32 %v2807_v53, %v2807_v53 }
 0x4fe   : > { %v1382_v27 = vpop.xlane.xlu0 %1381 }
 0x4ff   : > { %v1416_v60 = vsub.f32 %v2719_v34, %v1400_v58  ;;  %v1399_v61 = vmul.f32 0.03125, %v1382_v27  ;;  %1473 = vadd.xlane.f32.xlu0 %v1445_v59 }
 0x501   : > { %v1415_v30 = vsub.f32 %v2721_v36, %v1399_v61  ;;  %v2814_v28 = vmul.f32 %v2661_v54, %v1416_v60 }
 0x503   : > { %v1448_v0 = vmul.f32 %v2814_v28, %v2814_v28  ;;  %v2819_v1 = vmul.f32 %v2661_v54, %v1415_v30 }
 0x505   : > { %1479 = vadd.xlane.f32.xlu1 %v1448_v0  ;;  %v1447_v2 = vmul.f32 %v2819_v1, %v2819_v1 }
 0x507   : > { %1477 = vadd.xlane.f32.xlu0 %v1447_v2 }
 0x556   : > { %v1452_v4 = vpop.xlane.xlu1 %1451 }
 0x557   : > { %v1482_v34 = vmul.f32 0.03125, %v1452_v4 }
 0x559   : > { %v1498_v6 = vadd.f32 1e-05, %v1482_v34 }
 0x55a   : > { %v1450_v8 = vpop.xlane.xlu0 %1449 }
 0x55b   : > { %2091 = vrsqrt.f32 %v1498_v6  ;;  %v1481_v36 = vmul.f32 0.03125, %v1450_v8 }
 0x55d   : > { %v1497_v10 = vadd.f32 1e-05, %v1481_v36 }
 0x55e   : > { %v1456_v3 = vpop.xlane.xlu1 %1455 }
 0x55f   : > { %2093 = vrsqrt.f32 %v1497_v10  ;;  %v1484_v12 = vmul.f32 0.03125, %v1456_v3 }
 0x561   : > { %v1500_v13 = vadd.f32 1e-05, %v1484_v12 }
 0x562   : > { %v1454_v5 = vpop.xlane.xlu0 %1453 }
 0x563   : > { %2095 = vrsqrt.f32 %v1500_v13  ;;  %v1483_v54 = vmul.f32 0.03125, %v1454_v5 }
 0x565   : > { %v1499_v14 = vadd.f32 1e-05, %v1483_v54 }
 0x566   : > { %v1460_v18 = vpop.xlane.xlu1 %1459 }
 0x567   : > { %2097 = vrsqrt.f32 %v1499_v14  ;;  %v1486_v20 = vmul.f32 0.03125, %v1460_v18 }
 0x568   : > { %v2092_v22 = vpop.eup %2091  ;;  %v1458_v9 = vpop.xlane.xlu0 %1457 }
 0x569   : > { %v1530_v25 = vmul.f32 %v2092_v22, %v2729_v44  ;;  %v1502_v26 = vadd.f32 1e-05, %v1486_v20  ;;  %v1485_v11 = vmul.f32 0.03125, %v1458_v9  ;;  %v2126_v22 = vld [vmem:[%s3036_s2 + $0x20] sm:$0xff] }
 0x56b   : > { %v1552_v33 = vmul.f32 %v2826_v24, %v1530_v25  ;;  %2099 = vrsqrt.f32 %v1502_v26  ;;  %v1501_v35 = vadd.f32 1e-05, %v1485_v11 }
 0x56c   : > { %v2094_v37 = vpop.eup %2093 }
 0x56d   : > { %v1574_v15 = vadd.f32 %v2832_v31, %v1552_v33  ;;  %v1529_v38 = vmul.f32 %v2094_v37, %v2735_v50  ;;  %2101 = vrsqrt.f32 %v1501_v35 }
 0x56e   : > { %v1464_v39 = vpop.xlane.xlu1 %1463 }
 0x56f   : > { %1590 = vst [vmem:[%s3046_s12 + $0x8] sm:$0xff] %v1574_v15  ;;  %v1606_v44 = vadd.f32 %v1574_v15, %v2508_v49  ;;  %v1551_v17 = vmul.f32 %v2826_v24, %v1529_v38  ;;  %v1488_v41 = vmul.f32 0.03125, %v1464_v39  ;;  %v2123_v49 = vld [vmem:[%s3036_s2] sm:$0xff] }
 0x570   : > { %v2096_v43 = vpop.eup %2095  ;;  %v1462_v45 = vpop.xlane.xlu0 %1461 }
 0x571   : > { %1622 = vst [vmem:[%s3045_s11 + $0x8] sm:$0xff] %v1606_v44  ;;  %v1573_v46 = vadd.f32 %v2832_v31, %v1551_v17  ;;  %v1532_v50 = vmul.f32 %v2096_v43, %v2741_v56  ;;  %v1504_v21 = vadd.f32 1e-05, %v1488_v41  ;;  %v1487_v47 = vmul.f32 0.03125, %v1462_v45 }
 0x573   : > { %1589 = vst [vmem:[%s3046_s12] sm:$0xff] %v1573_v46  ;;  %v1605_v48 = vadd.f32 %v2123_v49, %v1573_v46  ;;  %v1554_v23 = vmul.f32 %v2826_v24, %v1532_v50  ;;  %2103 = vrsqrt.f32 %v1504_v21  ;;  %v1503_v52 = vadd.f32 1e-05, %v1487_v47  ;;  %v2128_v46 = vld [vmem:[%s3036_s2 + $0x30] sm:$0xff] }
 0x574   : > { %v2098_v55 = vpop.eup %2097 }
 0x575   : > { %1621 = vst [vmem:[%s3045_s11] sm:$0xff] %v1605_v48  ;;  %v1576_v56 = vadd.f32 %v2832_v31, %v1554_v23  ;;  %v1531_v58 = vmul.f32 %v2098_v55, %v2747_v62  ;;  %2105 = vrsqrt.f32 %v1503_v52 }
 0x576   : > { %v1468_v59 = vpop.xlane.xlu1 %1467 }
 0x577   : > { %1592 = vst [vmem:[%s3046_s12 + $0x18] sm:$0xff] %v1576_v56  ;;  %v1608_v27 = vadd.f32 %v1576_v56, %v2529_v57  ;;  %v1553_v60 = vmul.f32 %v2826_v24, %v1531_v58  ;;  %v1490_v61 = vmul.f32 0.03125, %v1468_v59  ;;  %v2124_v57 = vld [vmem:[%s3036_s2 + $0x10] sm:$0xff] }
 0x578   : > { %v2100_v30 = vpop.eup %2099  ;;  %v1466_v0 = vpop.xlane.xlu0 %1465 }
 0x579   : > { %1624 = vst [vmem:[%s3045_s11 + $0x18] sm:$0xff] %v1608_v27  ;;  %v1575_v2 = vadd.f32 %v2832_v31, %v1553_v60  ;;  %v1534_v62 = vmul.f32 %v2100_v30, %v2754_v63  ;;  %v1506_v4 = vadd.f32 1e-05, %v1490_v61  ;;  %v1489_v34 = vmul.f32 0.03125, %v1466_v0 }
 0x57a   : > { %v2102_v6 = vpop.eup %2101 }
 0x57b   : > { %1591 = vst [vmem:[%s3046_s12 + $0x10] sm:$0xff] %v1575_v2  ;;  %v1607_v8 = vadd.f32 %v2124_v57, %v1575_v2  ;;  %v1556_v36 = vmul.f32 %v2826_v24, %v1534_v62  ;;  %v1533_v10 = vmul.f32 %v2102_v6, %v2759_v7  ;;  %2107 = vrsqrt.f32 %v1506_v4  ;;  %v2125_v7 = vld [vmem:[%s3036_s2 + $0x28] sm:$0xff] }
 0x57c   : > { %v1505_v3 = vadd.f32 1e-05, %v1489_v34  ;;  %v2130_v34 = vld [vmem:[%s3036_s2 + $0x40] sm:$0xff] }
 0x57d   : > { %1623 = vst [vmem:[%s3045_s11 + $0x10] sm:$0xff] %v1607_v8  ;;  %v1578_v63 = vadd.f32 %v2832_v31, %v1556_v36  ;;  %v1555_v12 = vmul.f32 %v2826_v24, %v1533_v10 }
 0x57e   : > { %2109 = vrsqrt.f32 %v1505_v3  ;;  %v1472_v13 = vpop.xlane.xlu1 %1471  ;;  %v2131_v3 = vld [vmem:[%s3036_s2 + $0x58] sm:$0xff] }
 0x57f   : > { %1594 = vst [vmem:[%s3046_s12 + $0x28] sm:$0xff] %v1578_v63  ;;  %v1610_v5 = vadd.f32 %v2125_v7, %v1578_v63  ;;  %v1577_v54 = vadd.f32 %v2832_v31, %v1555_v12  ;;  %v1492_v14 = vmul.f32 0.03125, %v1472_v13  ;;  %v2132_v13 = vld [vmem:[%s3036_s2 + $0x50] sm:$0xff] }
 0x580   : > { %v2104_v18 = vpop.eup %2103  ;;  %v1470_v20 = vpop.xlane.xlu0 %1469 }
 0x581   : > { %1626 = vst [vmem:[%s3045_s11 + $0x28] sm:$0xff] %v1610_v5  ;;  %1593 = vst [vmem:[%s3046_s12 + $0x20] sm:$0xff] %v1577_v54  ;;  %v1609_v9 = vadd.f32 %v2126_v22, %v1577_v54  ;;  %v1536_v25 = vmul.f32 %v2104_v18, %v2766_v16  ;;  %v1508_v26 = vadd.f32 1e-05, %v1492_v14  ;;  %v1491_v11 = vmul.f32 0.03125, %v1470_v20  ;;  %v2127_v16 = vld [vmem:[%s3036_s2 + $0x38] sm:$0xff] }
 0x582   : > { %v2106_v33 = vpop.eup %2105 }
 0x583   : > { %1625 = vst [vmem:[%s3045_s11 + $0x20] sm:$0xff] %v1609_v9  ;;  %v1558_v35 = vmul.f32 %v2826_v24, %v1536_v25  ;;  %v1535_v37 = vmul.f32 %v2106_v33, %v2771_v19  ;;  %2111 = vrsqrt.f32 %v1508_v26  ;;  %v1507_v15 = vadd.f32 1e-05, %v1491_v11 }
 0x585   : > { %v1580_v38 = vadd.f32 %v2832_v31, %v1558_v35  ;;  %v1557_v39 = vmul.f32 %v2826_v24, %v1535_v37  ;;  %2113 = vrsqrt.f32 %v1507_v15 }
 0x586   : > { %v1476_v44 = vpop.xlane.xlu1 %1475 }
 0x587   : > { %1596 = vst [vmem:[%s3046_s12 + $0x38] sm:$0xff] %v1580_v38  ;;  %v1612_v17 = vadd.f32 %v2127_v16, %v1580_v38  ;;  %v1579_v41 = vadd.f32 %v2832_v31, %v1557_v39  ;;  %v1494_v19 = vmul.f32 0.03125, %v1476_v44 }
 0x588   : > { %v2108_v43 = vpop.eup %2107  ;;  %v1474_v45 = vpop.xlane.xlu0 %1473 }
 0x589   : > { %1628 = vst [vmem:[%s3045_s11 + $0x38] sm:$0xff] %v1612_v17  ;;  %1595 = vst [vmem:[%s3046_s12 + $0x30] sm:$0xff] %v1579_v41  ;;  %v1611_v50 = vadd.f32 %v2128_v46, %v1579_v41  ;;  %v1538_v21 = vmul.f32 %v2108_v43, %v2778_v29  ;;  %v1510_v47 = vadd.f32 1e-05, %v1494_v19  ;;  %v1493_v49 = vmul.f32 0.03125, %v1474_v45  ;;  %v2129_v29 = vld [vmem:[%s3036_s2 + $0x48] sm:$0xff] }
 0x58b   : > { %v2110_v48 = vpop.eup %2109  ;;  %1627 = vst [vmem:[%s3045_s11 + $0x30] sm:$0xff] %v1611_v50  ;;  %v1560_v23 = vmul.f32 %v2826_v24, %v1538_v21  ;;  %2115 = vrsqrt.f32 %v1510_v47  ;;  %v1509_v52 = vadd.f32 1e-05, %v1493_v49 }
 0x58c   : > { %v1537_v55 = vmul.f32 %v2110_v48, %v2783_v32 }
 0x58d   : > { %v1582_v56 = vadd.f32 %v2832_v31, %v1560_v23  ;;  %2117 = vrsqrt.f32 %v1509_v52 }
 0x58e   : > { %v1559_v58 = vmul.f32 %v2826_v24, %v1537_v55  ;;  %v1480_v59 = vpop.xlane.xlu1 %1479 }
 0x58f   : > { %1598 = vst [vmem:[%s3046_s12 + $0x48] sm:$0xff] %v1582_v56  ;;  %v1614_v27 = vadd.f32 %v2129_v29, %v1582_v56  ;;  %v1496_v60 = vmul.f32 0.03125, %v1480_v59 }
 0x590   : > { %v2112_v61 = vpop.eup %2111  ;;  %v1581_v30 = vadd.f32 %v2832_v31, %v1559_v58  ;;  %v1478_v32 = vpop.xlane.xlu0 %1477 }
 0x591   : > { %1630 = vst [vmem:[%s3045_s11 + $0x48] sm:$0xff] %v1614_v27  ;;  %v1540_v0 = vmul.f32 %v2112_v61, %v2790_v40  ;;  %v1512_v2 = vadd.f32 1e-05, %v1496_v60  ;;  %v1495_v62 = vmul.f32 0.03125, %v1478_v32 }
 0x592   : > { %v2114_v4 = vpop.eup %2113  ;;  %1597 = vst [vmem:[%s3046_s12 + $0x40] sm:$0xff] %v1581_v30  ;;  %v1613_v6 = vadd.f32 %v2130_v34, %v1581_v30 }
 0x593   : > { %v1562_v57 = vmul.f32 %v2826_v24, %v1540_v0  ;;  %v1539_v8 = vmul.f32 %v2114_v4, %v2795_v42  ;;  %2119 = vrsqrt.f32 %v1512_v2  ;;  %v1511_v36 = vadd.f32 1e-05, %v1495_v62 }
 0x594   : > { %1629 = vst [vmem:[%s3045_s11 + $0x40] sm:$0xff] %v1613_v6 }
 0x595   : > { %v1584_v40 = vadd.f32 %v2832_v31, %v1562_v57  ;;  %v1561_v10 = vmul.f32 %v2826_v24, %v1539_v8  ;;  %2121 = vrsqrt.f32 %v1511_v36 }
 0x597   : > { %1600 = vst [vmem:[%s3046_s12 + $0x58] sm:$0xff] %v1584_v40  ;;  %v1616_v42 = vadd.f32 %v2131_v3, %v1584_v40  ;;  %v1583_v63 = vadd.f32 %v2832_v31, %v1561_v10 }
 0x598   : > { %v2116_v12 = vpop.eup %2115 }
 0x599   : > { %1632 = vst [vmem:[%s3045_s11 + $0x58] sm:$0xff] %v1616_v42  ;;  %1599 = vst [vmem:[%s3046_s12 + $0x50] sm:$0xff] %v1583_v63  ;;  %v1615_v7 = vadd.f32 %v2132_v13, %v1583_v63  ;;  %v1542_v5 = vmul.f32 %v2116_v12, %v2802_v51  ;;  %v2133_v51 = vld [vmem:[%s3036_s2 + $0x68] sm:$0xff] }
 0x59a   : > { %v2118_v54 = vpop.eup %2117 }
 0x59b   : > { %1631 = vst [vmem:[%s3045_s11 + $0x50] sm:$0xff] %v1615_v7  ;;  %v1564_v14 = vmul.f32 %v2826_v24, %v1542_v5  ;;  %v1541_v18 = vmul.f32 %v2118_v54, %v2807_v53  ;;  %v2134_v53 = vld [vmem:[%s3036_s2 + $0x60] sm:$0xff] }
 0x59d   : > { %v1586_v20 = vadd.f32 %v2832_v31, %v1564_v14  ;;  %v1563_v22 = vmul.f32 %v2826_v24, %v1541_v18 }
 0x59f   : > { %1602 = vst [vmem:[%s3046_s12 + $0x68] sm:$0xff] %v1586_v20  ;;  %v1618_v9 = vadd.f32 %v2133_v51, %v1586_v20  ;;  %v1585_v25 = vadd.f32 %v2832_v31, %v1563_v22 }
 0x5a0   : > { %v2120_v26 = vpop.eup %2119 }
 0x5a1   : > { %1634 = vst [vmem:[%s3045_s11 + $0x68] sm:$0xff] %v1618_v9  ;;  %1601 = vst [vmem:[%s3046_s12 + $0x60] sm:$0xff] %v1585_v25  ;;  %v1617_v11 = vadd.f32 %v2134_v53, %v1585_v25  ;;  %v1544_v33 = vmul.f32 %v2120_v26, %v2814_v28  ;;  %v2135_v28 = vld [vmem:[%s3036_s2 + $0x78] sm:$0xff] }
 0x5a2   : > { %v2122_v35 = vpop.eup %2121 }
 0x5a3   : > { %1633 = vst [vmem:[%s3045_s11 + $0x60] sm:$0xff] %v1617_v11  ;;  %v1566_v37 = vmul.f32 %v2826_v24, %v1544_v33  ;;  %v1543_v15 = vmul.f32 %v2122_v35, %v2819_v1  ;;  %v2136_v1 = vld [vmem:[%s3036_s2 + $0x70] sm:$0xff] }
 0x5a5   : > { %v1588_v38 = vadd.f32 %v2832_v31, %v1566_v37  ;;  %v1565_v39 = vmul.f32 %v2826_v24, %v1543_v15 }
 0x5a7   : > { %1604 = vst [vmem:[%s3046_s12 + $0x78] sm:$0xff] %v1588_v38  ;;  %v1620_v44 = vadd.f32 %v2135_v28, %v1588_v38  ;;  %v1587_v16 = vadd.f32 %v2832_v31, %v1565_v39 }
 0x5a9   : > { %1636 = vst [vmem:[%s3045_s11 + $0x78] sm:$0xff] %v1620_v44  ;;  %1603 = vst [vmem:[%s3046_s12 + $0x70] sm:$0xff] %v1587_v16  ;;  %v1619_v24 = vadd.f32 %v2136_v1, %v1587_v16 }
 0x5ab   : > { %1635 = vst [vmem:[%s3045_s11 + $0x70] sm:$0xff] %v1619_v24 }
 0x5ac PF: > { %s3055_s23 = sld [smem:[#allocation6_spill]]  ;;  %p23_p2 = scmp.ge.s32.totalorder %s2293_s26, 4  }
 0x5ad   : > { %s3056_s29 = sld [smem:[#allocation7_spill]]  ;;  %s3057_s21 = smov %s2191_s22 }
 0x5ae   : > { %s3060_s24 = smov %s2293_s26 }
 0x5af   :  { %25 = sbr.rel (!%p23_p2) target bundleno = 3 (0x3), region = 119 }
 0x5b2   : > { %s3058_s22 = smov %s3055_s23 }
 0x5b3   : > { %s3059_s23 = smov %s3056_s29 }
 0x5b4   :  { %1654 = vsyncpa [#allocation4], 1 }
 0x5b5   :  { %1656 = vsyncpa [#allocation4 + $0x1], 1 }

</bundles_post_ra>
